<compile_context>
chip_gen: v5e
topology: v5e:2x2
jax: 0.10.0
libtpu: 0.0.40
codegen_flags: <defaults>
</compile_context>

<pallas_src>
import functools

import jax
import jax.numpy as jnp
from jax import lax
from jax.experimental import pallas as pl
from jax.experimental.pallas import tpu as pltpu

VOCAB = 10      # nn.Embedding(10, 10)
EMB = 10        # embedding dim == conv1d in_channels
C1_OUT = 10     # Conv1d(10, 10, kernel_size=5, padding=2)
KSIZE = 5
PAD = 2
SENTINEL = VOCAB   # padding id: matches no table entry -> contributes 0


def _round_up(x: int, m: int) -> int:
    return (x + m - 1) // m * m


def test2_kernel(ids_ref, table_ref, out_ref, *, chunk, need_left, need_right):
    """One (Bt, Lp) batch block.

    ids_ref  : (Bt, Lp) int32 VMEM   (Lp multiple of 128; pads == SENTINEL)
    table_ref: (KSIZE*VOCAB,) f32 SMEM  folded table, bias folded into row PAD
    out_ref  : (Bt, Lp) f32   VMEM
    """
    Bt, Lp = ids_ref.shape
    n_chunks = Bt // chunk
    any_edge = any(need_left) or any(need_right)

    # Hoist the 50 SMEM scalar reads out of the chunk loop (loop-invariant).
    tab = [[table_ref[k * VOCAB + v] for v in range(VOCAB)]
           for k in range(KSIZE)]

    def body(c, carry):
        r0 = pl.multiple_of(c * chunk, chunk)
        ids = ids_ref[pl.ds(r0, chunk), :]

        # taps[k][b, l] = T[k, ids[b, l]]   (ids >= VOCAB -> 0)
        # One compare per vocab value, shared by all KSIZE taps; live state is
        # only ids + KSIZE tap accumulators (bounded per chunk -> no spills).
        taps = [jnp.zeros((chunk, Lp), jnp.float32) for _ in range(KSIZE)]
        for v in range(VOCAB):
            m = ids == v
            for k in range(KSIZE):
                taps[k] = jnp.where(m, tab[k][v], taps[k])

        lane = (lax.broadcasted_iota(jnp.int32, (chunk, Lp), 1)
                if any_edge else None)

        # out[l] = sum_k T[k, ids[l - PAD + k]]  via lane rolls (XLU) + adds.
        acc = None
        for k in range(KSIZE):
            shift = (PAD - k) % Lp
            r = pltpu.roll(taps[k], shift=shift, axis=1) if shift else taps[k]
            if need_left[k]:      # lanes wrapped in from the right edge -> 0
                r = jnp.where(lane >= (PAD - k), r, 0.0)
            if need_right[k]:     # lanes wrapped in from the left edge -> 0
                r = jnp.where(lane < (Lp - (k - PAD)), r, 0.0)
            acc = r if acc is None else acc + r

        out_ref[pl.ds(r0, chunk), :] = acc
        return carry

    lax.fori_loop(0, n_chunks, body, 0)


def _fold_params(E, w1, b1, w2, b2):
    """Fold embedding -> conv1 -> conv2 into a (KSIZE*VOCAB,) f32 table.

    T[k, v] = w2 . w1[:, :, k] . E[v];  bias = w2 . b1 + b2 is added to row
    k = PAD, which contributes exactly once per (in-range) output lane.
    """
    w2_vec = w2.reshape(-1).astype(jnp.float32)                        # (C1_OUT,)
    table = jnp.einsum("c,cik,vi->kv", w2_vec, w1.astype(jnp.float32),
                       E.astype(jnp.float32),
                       precision=lax.Precision.HIGHEST)                # (KSIZE, VOCAB)
    bias = (jnp.dot(w2_vec, b1.astype(jnp.float32),
                    precision=lax.Precision.HIGHEST)
            + b2.astype(jnp.float32).reshape(()))
    table = table.at[PAD, :].add(bias)
    return table.reshape(-1)                                           # (50,)


def test2_forward(ids, E, w1, b1, w2, b2, *, max_block_rows=2048):
    """ids: (B, L) int -> (B, L) float32, matching Test2Model.forward."""
    B, L = ids.shape
    params = _fold_params(E, w1, b1, w2, b2)

    # Lane padding to a multiple of 128: dense, unmasked vregs on the load and
    # (most importantly) store path.  Sentinel ids give exactly 0 (== conv
    # zero-padding); if the pad is >= PAD, no in-kernel edge masks are needed.
    Lp = _round_up(L, 128)
    pad_l = Lp - L
    need_left = tuple((PAD - k) > pad_l for k in range(KSIZE))
    need_right = tuple((k - PAD) > pad_l for k in range(KSIZE))

    # Per-generation scoped-VMEM budget (v5e/v6e: 128 MiB phys, v7x: 64 MiB).
    try:
        vmem_cap = int(pltpu.get_tpu_info().vmem_capacity_bytes)
    except Exception:
        vmem_cap = 64 * 1024 * 1024
    vmem_limit = max(16 * 1024 * 1024, min(vmem_cap // 2, 64 * 1024 * 1024))

    # Batch tiling: big sublane-dense blocks (amortize grid-step overhead and
    # the 50 SMEM scalar reads), capped so double-buffered ids+out (16 B/elem)
    # use <= half the scoped budget, and capped at ceil(B/2) rows so there are
    # >= 2 grid steps and the "parallel" axis spans both v7x TensorCores.
    Bp0 = _round_up(B, 8)
    cap_rows = max(8, ((vmem_limit // 2) // (16 * Lp)) // 8 * 8)
    two_step_cap = max(8, _round_up((Bp0 + 1) // 2, 8))
    Bt = max(8, (min(max_block_rows, cap_rows, two_step_cap) // 8) * 8)
    Bp = _round_up(Bp0, Bt)
    # TODO(synk): add L-tiling with a +/-PAD halo for extremely long sequences
    # (Lp > ~128K lanes), where even an 8-row block exceeds the VMEM budget.

    # Inner chunk: largest of 32/16/8 rows that divides Bt and keeps each
    # (chunk, Lp) f32 array within ~4 vregs so live ranges never spill.
    chunk = 8
    for c in (32, 16, 8):
        if Bt % c == 0 and c * Lp <= 32 * 128:
            chunk = c
            break

    ids_i = ids.astype(jnp.int32)
    if Bp != B or pad_l:
        ids_i = jnp.pad(ids_i, ((0, Bp - B), (0, pad_l)),
                        constant_values=SENTINEL)

    kernel = functools.partial(test2_kernel, chunk=chunk,
                               need_left=need_left, need_right=need_right)

    out = pl.pallas_call(
        kernel,
        out_shape=jax.ShapeDtypeStruct((Bp, Lp), jnp.float32),
        grid=(Bp // Bt,),
        in_specs=[
            pl.BlockSpec((Bt, Lp), lambda b: (b, 0)),   # ids tile (VMEM)
            pl.BlockSpec(memory_space=pltpu.SMEM),      # folded table (SMEM)
        ],
        out_specs=pl.BlockSpec((Bt, Lp), lambda b: (b, 0)),
        compiler_params=pltpu.CompilerParams(
            dimension_semantics=("parallel",),          # megacore on v7x
            vmem_limit_bytes=int(vmem_limit)),
    )(ids_i, params)
    return out[:B, :L]


def reference_forward(ids, E, w1, b1, w2, b2):
    """Plain-JAX reference matching the PyTorch module exactly."""
    emb = E[ids]                                            # (B, L, EMB)
    xc = jnp.transpose(emb, (0, 2, 1))                      # (B, EMB, L)
    y1 = lax.conv_general_dilated(
        xc, w1, window_strides=(1,), padding=[(PAD, PAD)],
        dimension_numbers=("NCH", "OIH", "NCH"),
        precision=lax.Precision.HIGHEST) + b1[None, :, None]
    y2 = lax.conv_general_dilated(
        y1, w2, window_strides=(1,), padding=[(0, 0)],
        dimension_numbers=("NCH", "OIH", "NCH"),
        precision=lax.Precision.HIGHEST) + b2[None, :, None]
    return jnp.transpose(y2, (0, 2, 1))[..., 0]             # (B, L)


if __name__ == "__main__":
    key = jax.random.PRNGKey(0)
    k1, k2, k3, k4, k5, k6, k7 = jax.random.split(key, 7)

    # Deterministic synthetic parameters (shapes from the module __init__).
    E = jax.random.normal(k1, (VOCAB, EMB), jnp.float32)                  # Embedding(10, 10)
    w1 = jax.random.normal(k2, (C1_OUT, EMB, KSIZE), jnp.float32) * 0.1   # Conv1d(10,10,5)
    b1 = jax.random.normal(k3, (C1_OUT,), jnp.float32) * 0.1
    w2 = jax.random.normal(k4, (1, C1_OUT, 1), jnp.float32) * 0.1         # Conv1d(10,1,1)
    b2 = jax.random.normal(k5, (1,), jnp.float32) * 0.1

    # Case 1: L multiple of 128 -> exercises the in-kernel conv edge masks,
    # two "parallel" grid steps (Bt=64) and the 32-row inner chunk loop.
    B1, L1 = 128, 128
    ids1 = jax.random.randint(k6, (B1, L1), 0, VOCAB, dtype=jnp.int32)
    out1 = jax.block_until_ready(test2_forward(ids1, E, w1, b1, w2, b2))
    ref1 = jax.block_until_ready(reference_forward(ids1, E, w1, b1, w2, b2))
    assert out1.shape == (B1, L1), out1.shape
    err1 = jnp.max(jnp.abs(out1 - ref1))
    assert jnp.allclose(out1, ref1, rtol=1e-4, atol=1e-4), f"max abs err {err1}"

    # Case 2: ragged B/L -> exercises sentinel lane-padding (no edge masks)
    # and batch-row padding.
    B2, L2 = 18, 50
    ids2 = jax.random.randint(k7, (B2, L2), 0, VOCAB, dtype=jnp.int32)
    out2 = jax.block_until_ready(test2_forward(ids2, E, w1, b1, w2, b2))
    ref2 = jax.block_until_ready(reference_forward(ids2, E, w1, b1, w2, b2))
    assert out2.shape == (B2, L2), out2.shape
    err2 = jnp.max(jnp.abs(out2 - ref2))
    assert jnp.allclose(out2, ref2, rtol=1e-4, atol=1e-4), f"max abs err {err2}"

    print("KERNEL_OK")
</pallas_src>

<mosaic_0001>
module attributes {stable_mosaic.version = 11 : i64} {
  func.func @test2_kernel(%arg0: i32, %arg1: memref<64x128xi32, #tpu.memory_space<vmem>>, %arg2: memref<50xf32, #tpu.memory_space<smem>>, %arg3: memref<64x128xf32, #tpu.memory_space<vmem>>) attributes {dimension_semantics = [#tpu.dimension_semantics<parallel>], iteration_bounds = array<i64: 2>, scalar_prefetch = 0 : i64, scratch_operands = 0 : i64, tpu.core_type = #tpu.core_type<tc>, window_params = [{transform_indices = @transform_0, window_bounds = array<i64: 64, 128>}, {transform_indices = @transform_1, window_bounds = array<i64: 50>}, {transform_indices = @transform_2, window_bounds = array<i64: 64, 128>}]} {
    %c0 = arith.constant 0 : index
    %0 = memref.load %arg2[%c0] : memref<50xf32, #tpu.memory_space<smem>>
    %c1 = arith.constant 1 : index
    %1 = memref.load %arg2[%c1] : memref<50xf32, #tpu.memory_space<smem>>
    %c2 = arith.constant 2 : index
    %2 = memref.load %arg2[%c2] : memref<50xf32, #tpu.memory_space<smem>>
    %c3 = arith.constant 3 : index
    %3 = memref.load %arg2[%c3] : memref<50xf32, #tpu.memory_space<smem>>
    %c4 = arith.constant 4 : index
    %4 = memref.load %arg2[%c4] : memref<50xf32, #tpu.memory_space<smem>>
    %c5 = arith.constant 5 : index
    %5 = memref.load %arg2[%c5] : memref<50xf32, #tpu.memory_space<smem>>
    %c6 = arith.constant 6 : index
    %6 = memref.load %arg2[%c6] : memref<50xf32, #tpu.memory_space<smem>>
    %c7 = arith.constant 7 : index
    %7 = memref.load %arg2[%c7] : memref<50xf32, #tpu.memory_space<smem>>
    %c8 = arith.constant 8 : index
    %8 = memref.load %arg2[%c8] : memref<50xf32, #tpu.memory_space<smem>>
    %c9 = arith.constant 9 : index
    %9 = memref.load %arg2[%c9] : memref<50xf32, #tpu.memory_space<smem>>
    %c10 = arith.constant 10 : index
    %10 = memref.load %arg2[%c10] : memref<50xf32, #tpu.memory_space<smem>>
    %c11 = arith.constant 11 : index
    %11 = memref.load %arg2[%c11] : memref<50xf32, #tpu.memory_space<smem>>
    %c12 = arith.constant 12 : index
    %12 = memref.load %arg2[%c12] : memref<50xf32, #tpu.memory_space<smem>>
    %c13 = arith.constant 13 : index
    %13 = memref.load %arg2[%c13] : memref<50xf32, #tpu.memory_space<smem>>
    %c14 = arith.constant 14 : index
    %14 = memref.load %arg2[%c14] : memref<50xf32, #tpu.memory_space<smem>>
    %c15 = arith.constant 15 : index
    %15 = memref.load %arg2[%c15] : memref<50xf32, #tpu.memory_space<smem>>
    %c16 = arith.constant 16 : index
    %16 = memref.load %arg2[%c16] : memref<50xf32, #tpu.memory_space<smem>>
    %c17 = arith.constant 17 : index
    %17 = memref.load %arg2[%c17] : memref<50xf32, #tpu.memory_space<smem>>
    %c18 = arith.constant 18 : index
    %18 = memref.load %arg2[%c18] : memref<50xf32, #tpu.memory_space<smem>>
    %c19 = arith.constant 19 : index
    %19 = memref.load %arg2[%c19] : memref<50xf32, #tpu.memory_space<smem>>
    %c20 = arith.constant 20 : index
    %20 = memref.load %arg2[%c20] : memref<50xf32, #tpu.memory_space<smem>>
    %c21 = arith.constant 21 : index
    %21 = memref.load %arg2[%c21] : memref<50xf32, #tpu.memory_space<smem>>
    %c22 = arith.constant 22 : index
    %22 = memref.load %arg2[%c22] : memref<50xf32, #tpu.memory_space<smem>>
    %c23 = arith.constant 23 : index
    %23 = memref.load %arg2[%c23] : memref<50xf32, #tpu.memory_space<smem>>
    %c24 = arith.constant 24 : index
    %24 = memref.load %arg2[%c24] : memref<50xf32, #tpu.memory_space<smem>>
    %c25 = arith.constant 25 : index
    %25 = memref.load %arg2[%c25] : memref<50xf32, #tpu.memory_space<smem>>
    %c26 = arith.constant 26 : index
    %26 = memref.load %arg2[%c26] : memref<50xf32, #tpu.memory_space<smem>>
    %c27 = arith.constant 27 : index
    %27 = memref.load %arg2[%c27] : memref<50xf32, #tpu.memory_space<smem>>
    %c28 = arith.constant 28 : index
    %28 = memref.load %arg2[%c28] : memref<50xf32, #tpu.memory_space<smem>>
    %c29 = arith.constant 29 : index
    %29 = memref.load %arg2[%c29] : memref<50xf32, #tpu.memory_space<smem>>
    %c30 = arith.constant 30 : index
    %30 = memref.load %arg2[%c30] : memref<50xf32, #tpu.memory_space<smem>>
    %c31 = arith.constant 31 : index
    %31 = memref.load %arg2[%c31] : memref<50xf32, #tpu.memory_space<smem>>
    %c32 = arith.constant 32 : index
    %32 = memref.load %arg2[%c32] : memref<50xf32, #tpu.memory_space<smem>>
    %c33 = arith.constant 33 : index
    %33 = memref.load %arg2[%c33] : memref<50xf32, #tpu.memory_space<smem>>
    %c34 = arith.constant 34 : index
    %34 = memref.load %arg2[%c34] : memref<50xf32, #tpu.memory_space<smem>>
    %c35 = arith.constant 35 : index
    %35 = memref.load %arg2[%c35] : memref<50xf32, #tpu.memory_space<smem>>
    %c36 = arith.constant 36 : index
    %36 = memref.load %arg2[%c36] : memref<50xf32, #tpu.memory_space<smem>>
    %c37 = arith.constant 37 : index
    %37 = memref.load %arg2[%c37] : memref<50xf32, #tpu.memory_space<smem>>
    %c38 = arith.constant 38 : index
    %38 = memref.load %arg2[%c38] : memref<50xf32, #tpu.memory_space<smem>>
    %c39 = arith.constant 39 : index
    %39 = memref.load %arg2[%c39] : memref<50xf32, #tpu.memory_space<smem>>
    %c40 = arith.constant 40 : index
    %40 = memref.load %arg2[%c40] : memref<50xf32, #tpu.memory_space<smem>>
    %c41 = arith.constant 41 : index
    %41 = memref.load %arg2[%c41] : memref<50xf32, #tpu.memory_space<smem>>
    %c42 = arith.constant 42 : index
    %42 = memref.load %arg2[%c42] : memref<50xf32, #tpu.memory_space<smem>>
    %c43 = arith.constant 43 : index
    %43 = memref.load %arg2[%c43] : memref<50xf32, #tpu.memory_space<smem>>
    %c44 = arith.constant 44 : index
    %44 = memref.load %arg2[%c44] : memref<50xf32, #tpu.memory_space<smem>>
    %c45 = arith.constant 45 : index
    %45 = memref.load %arg2[%c45] : memref<50xf32, #tpu.memory_space<smem>>
    %c46 = arith.constant 46 : index
    %46 = memref.load %arg2[%c46] : memref<50xf32, #tpu.memory_space<smem>>
    %c47 = arith.constant 47 : index
    %47 = memref.load %arg2[%c47] : memref<50xf32, #tpu.memory_space<smem>>
    %c48 = arith.constant 48 : index
    %48 = memref.load %arg2[%c48] : memref<50xf32, #tpu.memory_space<smem>>
    %c49 = arith.constant 49 : index
    %49 = memref.load %arg2[%c49] : memref<50xf32, #tpu.memory_space<smem>>
    %c0_i32 = arith.constant 0 : i32
    %c2_i32 = arith.constant 2 : i32
    %50 = arith.addi %c0_i32, %c2_i32 : i32
    %c1_i32 = arith.constant 1 : i32
    scf.for %arg4 = %c0_i32 to %50 step %c1_i32  : i32 {
      %c32_i32 = arith.constant 32 : i32
      %51 = arith.muli %arg4, %c32_i32 : i32
      %52 = tpu.assume_multiple %51, 32 : i32
      %53 = arith.index_cast %52 : i32 to index
      %c0_1 = arith.constant 0 : index
      %54 = vector.load %arg1[%53, %c0_1] : memref<64x128xi32, #tpu.memory_space<vmem>>, vector<32x128xi32>
      %cst = arith.constant 0.000000e+00 : f32
      %55 = vector.broadcast %cst : f32 to vector<32x128xf32>
      %cst_2 = arith.constant 0.000000e+00 : f32
      %56 = vector.broadcast %cst_2 : f32 to vector<32x128xf32>
      %cst_3 = arith.constant 0.000000e+00 : f32
      %57 = vector.broadcast %cst_3 : f32 to vector<32x128xf32>
      %cst_4 = arith.constant 0.000000e+00 : f32
      %58 = vector.broadcast %cst_4 : f32 to vector<32x128xf32>
      %cst_5 = arith.constant 0.000000e+00 : f32
      %59 = vector.broadcast %cst_5 : f32 to vector<32x128xf32>
      %c0_i32_6 = arith.constant 0 : i32
      %60 = vector.broadcast %c0_i32_6 : i32 to vector<32x128xi32>
      %61 = arith.cmpi eq, %54, %60 : vector<32x128xi32>
      %62 = vector.broadcast %0 : f32 to vector<32x128xf32>
      %63 = arith.select %61, %62, %55 : vector<32x128xi1>, vector<32x128xf32>
      %64 = vector.broadcast %10 : f32 to vector<32x128xf32>
      %65 = arith.select %61, %64, %56 : vector<32x128xi1>, vector<32x128xf32>
      %66 = vector.broadcast %20 : f32 to vector<32x128xf32>
      %67 = arith.select %61, %66, %57 : vector<32x128xi1>, vector<32x128xf32>
      %68 = vector.broadcast %30 : f32 to vector<32x128xf32>
      %69 = arith.select %61, %68, %58 : vector<32x128xi1>, vector<32x128xf32>
      %70 = vector.broadcast %40 : f32 to vector<32x128xf32>
      %71 = arith.select %61, %70, %59 : vector<32x128xi1>, vector<32x128xf32>
      %c1_i32_7 = arith.constant 1 : i32
      %72 = vector.broadcast %c1_i32_7 : i32 to vector<32x128xi32>
      %73 = arith.cmpi eq, %54, %72 : vector<32x128xi32>
      %74 = vector.broadcast %1 : f32 to vector<32x128xf32>
      %75 = arith.select %73, %74, %63 : vector<32x128xi1>, vector<32x128xf32>
      %76 = vector.broadcast %11 : f32 to vector<32x128xf32>
      %77 = arith.select %73, %76, %65 : vector<32x128xi1>, vector<32x128xf32>
      %78 = vector.broadcast %21 : f32 to vector<32x128xf32>
      %79 = arith.select %73, %78, %67 : vector<32x128xi1>, vector<32x128xf32>
      %80 = vector.broadcast %31 : f32 to vector<32x128xf32>
      %81 = arith.select %73, %80, %69 : vector<32x128xi1>, vector<32x128xf32>
      %82 = vector.broadcast %41 : f32 to vector<32x128xf32>
      %83 = arith.select %73, %82, %71 : vector<32x128xi1>, vector<32x128xf32>
      %c2_i32_8 = arith.constant 2 : i32
      %84 = vector.broadcast %c2_i32_8 : i32 to vector<32x128xi32>
      %85 = arith.cmpi eq, %54, %84 : vector<32x128xi32>
      %86 = vector.broadcast %2 : f32 to vector<32x128xf32>
      %87 = arith.select %85, %86, %75 : vector<32x128xi1>, vector<32x128xf32>
      %88 = vector.broadcast %12 : f32 to vector<32x128xf32>
      %89 = arith.select %85, %88, %77 : vector<32x128xi1>, vector<32x128xf32>
      %90 = vector.broadcast %22 : f32 to vector<32x128xf32>
      %91 = arith.select %85, %90, %79 : vector<32x128xi1>, vector<32x128xf32>
      %92 = vector.broadcast %32 : f32 to vector<32x128xf32>
      %93 = arith.select %85, %92, %81 : vector<32x128xi1>, vector<32x128xf32>
      %94 = vector.broadcast %42 : f32 to vector<32x128xf32>
      %95 = arith.select %85, %94, %83 : vector<32x128xi1>, vector<32x128xf32>
      %c3_i32 = arith.constant 3 : i32
      %96 = vector.broadcast %c3_i32 : i32 to vector<32x128xi32>
      %97 = arith.cmpi eq, %54, %96 : vector<32x128xi32>
      %98 = vector.broadcast %3 : f32 to vector<32x128xf32>
      %99 = arith.select %97, %98, %87 : vector<32x128xi1>, vector<32x128xf32>
      %100 = vector.broadcast %13 : f32 to vector<32x128xf32>
      %101 = arith.select %97, %100, %89 : vector<32x128xi1>, vector<32x128xf32>
      %102 = vector.broadcast %23 : f32 to vector<32x128xf32>
      %103 = arith.select %97, %102, %91 : vector<32x128xi1>, vector<32x128xf32>
      %104 = vector.broadcast %33 : f32 to vector<32x128xf32>
      %105 = arith.select %97, %104, %93 : vector<32x128xi1>, vector<32x128xf32>
      %106 = vector.broadcast %43 : f32 to vector<32x128xf32>
      %107 = arith.select %97, %106, %95 : vector<32x128xi1>, vector<32x128xf32>
      %c4_i32 = arith.constant 4 : i32
      %108 = vector.broadcast %c4_i32 : i32 to vector<32x128xi32>
      %109 = arith.cmpi eq, %54, %108 : vector<32x128xi32>
      %110 = vector.broadcast %4 : f32 to vector<32x128xf32>
      %111 = arith.select %109, %110, %99 : vector<32x128xi1>, vector<32x128xf32>
      %112 = vector.broadcast %14 : f32 to vector<32x128xf32>
      %113 = arith.select %109, %112, %101 : vector<32x128xi1>, vector<32x128xf32>
      %114 = vector.broadcast %24 : f32 to vector<32x128xf32>
      %115 = arith.select %109, %114, %103 : vector<32x128xi1>, vector<32x128xf32>
      %116 = vector.broadcast %34 : f32 to vector<32x128xf32>
      %117 = arith.select %109, %116, %105 : vector<32x128xi1>, vector<32x128xf32>
      %118 = vector.broadcast %44 : f32 to vector<32x128xf32>
      %119 = arith.select %109, %118, %107 : vector<32x128xi1>, vector<32x128xf32>
      %c5_i32 = arith.constant 5 : i32
      %120 = vector.broadcast %c5_i32 : i32 to vector<32x128xi32>
      %121 = arith.cmpi eq, %54, %120 : vector<32x128xi32>
      %122 = vector.broadcast %5 : f32 to vector<32x128xf32>
      %123 = arith.select %121, %122, %111 : vector<32x128xi1>, vector<32x128xf32>
      %124 = vector.broadcast %15 : f32 to vector<32x128xf32>
      %125 = arith.select %121, %124, %113 : vector<32x128xi1>, vector<32x128xf32>
      %126 = vector.broadcast %25 : f32 to vector<32x128xf32>
      %127 = arith.select %121, %126, %115 : vector<32x128xi1>, vector<32x128xf32>
      %128 = vector.broadcast %35 : f32 to vector<32x128xf32>
      %129 = arith.select %121, %128, %117 : vector<32x128xi1>, vector<32x128xf32>
      %130 = vector.broadcast %45 : f32 to vector<32x128xf32>
      %131 = arith.select %121, %130, %119 : vector<32x128xi1>, vector<32x128xf32>
      %c6_i32 = arith.constant 6 : i32
      %132 = vector.broadcast %c6_i32 : i32 to vector<32x128xi32>
      %133 = arith.cmpi eq, %54, %132 : vector<32x128xi32>
      %134 = vector.broadcast %6 : f32 to vector<32x128xf32>
      %135 = arith.select %133, %134, %123 : vector<32x128xi1>, vector<32x128xf32>
      %136 = vector.broadcast %16 : f32 to vector<32x128xf32>
      %137 = arith.select %133, %136, %125 : vector<32x128xi1>, vector<32x128xf32>
      %138 = vector.broadcast %26 : f32 to vector<32x128xf32>
      %139 = arith.select %133, %138, %127 : vector<32x128xi1>, vector<32x128xf32>
      %140 = vector.broadcast %36 : f32 to vector<32x128xf32>
      %141 = arith.select %133, %140, %129 : vector<32x128xi1>, vector<32x128xf32>
      %142 = vector.broadcast %46 : f32 to vector<32x128xf32>
      %143 = arith.select %133, %142, %131 : vector<32x128xi1>, vector<32x128xf32>
      %c7_i32 = arith.constant 7 : i32
      %144 = vector.broadcast %c7_i32 : i32 to vector<32x128xi32>
      %145 = arith.cmpi eq, %54, %144 : vector<32x128xi32>
      %146 = vector.broadcast %7 : f32 to vector<32x128xf32>
      %147 = arith.select %145, %146, %135 : vector<32x128xi1>, vector<32x128xf32>
      %148 = vector.broadcast %17 : f32 to vector<32x128xf32>
      %149 = arith.select %145, %148, %137 : vector<32x128xi1>, vector<32x128xf32>
      %150 = vector.broadcast %27 : f32 to vector<32x128xf32>
      %151 = arith.select %145, %150, %139 : vector<32x128xi1>, vector<32x128xf32>
      %152 = vector.broadcast %37 : f32 to vector<32x128xf32>
      %153 = arith.select %145, %152, %141 : vector<32x128xi1>, vector<32x128xf32>
      %154 = vector.broadcast %47 : f32 to vector<32x128xf32>
      %155 = arith.select %145, %154, %143 : vector<32x128xi1>, vector<32x128xf32>
      %c8_i32 = arith.constant 8 : i32
      %156 = vector.broadcast %c8_i32 : i32 to vector<32x128xi32>
      %157 = arith.cmpi eq, %54, %156 : vector<32x128xi32>
      %158 = vector.broadcast %8 : f32 to vector<32x128xf32>
      %159 = arith.select %157, %158, %147 : vector<32x128xi1>, vector<32x128xf32>
      %160 = vector.broadcast %18 : f32 to vector<32x128xf32>
      %161 = arith.select %157, %160, %149 : vector<32x128xi1>, vector<32x128xf32>
      %162 = vector.broadcast %28 : f32 to vector<32x128xf32>
      %163 = arith.select %157, %162, %151 : vector<32x128xi1>, vector<32x128xf32>
      %164 = vector.broadcast %38 : f32 to vector<32x128xf32>
      %165 = arith.select %157, %164, %153 : vector<32x128xi1>, vector<32x128xf32>
      %166 = vector.broadcast %48 : f32 to vector<32x128xf32>
      %167 = arith.select %157, %166, %155 : vector<32x128xi1>, vector<32x128xf32>
      %c9_i32 = arith.constant 9 : i32
      %168 = vector.broadcast %c9_i32 : i32 to vector<32x128xi32>
      %169 = arith.cmpi eq, %54, %168 : vector<32x128xi32>
      %170 = vector.broadcast %9 : f32 to vector<32x128xf32>
      %171 = arith.select %169, %170, %159 : vector<32x128xi1>, vector<32x128xf32>
      %172 = vector.broadcast %19 : f32 to vector<32x128xf32>
      %173 = arith.select %169, %172, %161 : vector<32x128xi1>, vector<32x128xf32>
      %174 = vector.broadcast %29 : f32 to vector<32x128xf32>
      %175 = arith.select %169, %174, %163 : vector<32x128xi1>, vector<32x128xf32>
      %176 = vector.broadcast %39 : f32 to vector<32x128xf32>
      %177 = arith.select %169, %176, %165 : vector<32x128xi1>, vector<32x128xf32>
      %178 = vector.broadcast %49 : f32 to vector<32x128xf32>
      %179 = arith.select %169, %178, %167 : vector<32x128xi1>, vector<32x128xf32>
      %180 = tpu.iota {dimensions = array<i32: 1>} : vector<32x128xi32>
      %c2_i32_9 = arith.constant 2 : i32
      %181 = tpu.dynamic_rotate %171 by %c2_i32_9 dim 1 : vector<32x128xf32>, i32 -> vector<32x128xf32>
      %c2_i32_10 = arith.constant 2 : i32
      %182 = vector.broadcast %c2_i32_10 : i32 to vector<32x128xi32>
      %183 = arith.cmpi sge, %180, %182 : vector<32x128xi32>
      %cst_11 = arith.constant 0.000000e+00 : f32
      %184 = vector.broadcast %cst_11 : f32 to vector<32x128xf32>
      %185 = arith.select %183, %181, %184 : vector<32x128xi1>, vector<32x128xf32>
      %c1_i32_12 = arith.constant 1 : i32
      %186 = tpu.dynamic_rotate %173 by %c1_i32_12 dim 1 : vector<32x128xf32>, i32 -> vector<32x128xf32>
      %c1_i32_13 = arith.constant 1 : i32
      %187 = vector.broadcast %c1_i32_13 : i32 to vector<32x128xi32>
      %188 = arith.cmpi sge, %180, %187 : vector<32x128xi32>
      %cst_14 = arith.constant 0.000000e+00 : f32
      %189 = vector.broadcast %cst_14 : f32 to vector<32x128xf32>
      %190 = arith.select %188, %186, %189 : vector<32x128xi1>, vector<32x128xf32>
      %191 = arith.addf %185, %190 : vector<32x128xf32>
      %192 = arith.addf %191, %175 : vector<32x128xf32>
      %c127_i32 = arith.constant 127 : i32
      %193 = tpu.dynamic_rotate %177 by %c127_i32 dim 1 : vector<32x128xf32>, i32 -> vector<32x128xf32>
      %c127_i32_15 = arith.constant 127 : i32
      %194 = vector.broadcast %c127_i32_15 : i32 to vector<32x128xi32>
      %195 = arith.cmpi slt, %180, %194 : vector<32x128xi32>
      %cst_16 = arith.constant 0.000000e+00 : f32
      %196 = vector.broadcast %cst_16 : f32 to vector<32x128xf32>
      %197 = arith.select %195, %193, %196 : vector<32x128xi1>, vector<32x128xf32>
      %198 = arith.addf %192, %197 : vector<32x128xf32>
      %c126_i32 = arith.constant 126 : i32
      %199 = tpu.dynamic_rotate %179 by %c126_i32 dim 1 : vector<32x128xf32>, i32 -> vector<32x128xf32>
      %c126_i32_17 = arith.constant 126 : i32
      %200 = vector.broadcast %c126_i32_17 : i32 to vector<32x128xi32>
      %201 = arith.cmpi slt, %180, %200 : vector<32x128xi32>
      %cst_18 = arith.constant 0.000000e+00 : f32
      %202 = vector.broadcast %cst_18 : f32 to vector<32x128xf32>
      %203 = arith.select %201, %199, %202 : vector<32x128xi1>, vector<32x128xf32>
      %204 = arith.addf %198, %203 : vector<32x128xf32>
      %205 = arith.index_cast %52 : i32 to index
      %c0_19 = arith.constant 0 : index
      %206 = vector.load %arg3[%205, %c0_19] : memref<64x128xf32, #tpu.memory_space<vmem>>, vector<32x128xf32>
      tpu.vector_store %arg3[%205, %c0_19], %204 {strides = array<i32>} : memref<64x128xf32, #tpu.memory_space<vmem>>, vector<32x128xf32>,
    }
    %c2_i32_0 = arith.constant 2 : i32
    return
  }
  func.func @transform_0(%arg0: i32) -> (i32, i32) {
    %c0_i32 = arith.constant 0 : i32
    %c0_i32_0 = arith.constant 0 : i32
    return %arg0, %c0_i32 : i32, i32
  }
  func.func @transform_1(%arg0: i32) -> i32 {
    %c0_i32 = arith.constant 0 : i32
    %c0_i32_0 = arith.constant 0 : i32
    return %c0_i32 : i32
  }
  func.func @transform_2(%arg0: i32) -> (i32, i32) {
    %c0_i32 = arith.constant 0 : i32
    %c0_i32_0 = arith.constant 0 : i32
    return %arg0, %c0_i32 : i32, i32
  }
}

</mosaic_0001>

<bundles_post_ra>
// kernel: tpu_custom_call.1
= control target key start
LH: loop header
LB: loop body
LE: loop exit
PB: predicated region body
PF: predicated region fallthrough
CT: control target
= control target key end

     0   :  { %s2020_s0 = inlined_call_operand.hbm [shape: s32[128,128], index: 0, kind: input, shape index: {}]   ;;  %s2021_s1 = inlined_call_operand.hbm [shape: f32[50], index: 1, kind: input, shape index: {}]   ;;  %s2022_s2 = inlined_call_operand.hbm [shape: f32[128,128], index: 2, kind: output, shape index: {}]  }
   0x1   :  { %2071 = sst [smem:[#allocation53_spill]] %s2020_s0 }
   0x2   :  { %2072 = sst [smem:[#allocation54_spill]] %s2021_s1 }
   0x3   :  { %2073 = sst [smem:[#allocation55_spill]] %s2022_s2 }
   0x4   :  { %7 = vsyncpa [#allocation3], 0 }
   0x5   :  { %9 = vsyncpa [#allocation3 + $0x1], 0 }
   0x6   :  { %10 = vsyncpa [#allocation5], 0 }
   0x7   :  { %11 = vsyncpa [#allocation4], 0 }
   0x8   :  { %13 = vsyncpa [#allocation4 + $0x1], 0  ;;  %s1007_s9 = smov 0   ;;  %s1009_s10 = smov 0  }
   0x9   :  { %s1011_s11 = smov 0   ;;  %s1013_s12 = smov 0  }
   0xa LB: > { %2074 = sst [smem:[#allocation11_spill]] %s965_s9  ;;  %s1028_s13 = sadd.s32 4294967295, %s977_s12   ;;  %s977_s12 = sphi %s1013_s12, %s2283_s12   ;;  %s973_s11 = sphi %s1011_s11, %s2286_s11   ;;  %s969_s10 = sphi %s1009_s10, %s2285_s10   ;;  %s965_s9 = sphi %s1007_s9, %s2284_s9  }
   0xb   : > { %2075 = sst [smem:[#allocation12_spill]] %s969_s10  ;;  %s717_s14 = sadd.s32 4294967294, %s977_s12  }
   0xc   : > { %2076 = sst [smem:[#allocation13_spill]] %s973_s11  ;;  %s1032_s15 = sadd.s32 1, %s977_s12  }
   0xd   : > { %2077 = sst [smem:[#allocation14_spill]] %s977_s12  ;;  %s26_s16 = sadd.s32 1, %s973_s11 }
   0xe   : > { %2078 = sst [smem:[#allocation15_spill]] %s1028_s13  ;;  %s23_s17 = ssub.s32 %s977_s12, %s1032_s15 }
   0xf   : > { %2079 = sst [smem:[#allocation16_spill]] %s1032_s15  ;;  %p33_p0 = scmp.ne.s32.totalorder %s973_s11, %s969_s10 }
  0x10   : > { %p24_p1 = scmp.eq.s32.totalorder %s23_s17, 0  ;;  %p34_p2 = scmp.eq.s32.totalorder %s977_s12, 0 }
  0x11   : > { %p39_p3 = scmp.ne.s32.totalorder %s969_s10, %s965_s9  ;;  %p40_p4 = scmp.eq.s32.totalorder %s1028_s13, 0 }
  0x12   : > { %s1044_s18 = scalar_select %p24_p1, %s973_s11, %s26_s16  }
  0x13   : > { %p1046_p5 = por %p34_p2, %p33_p0  ;;  %p1052_p6 = por %p40_p4, %p39_p3 }
  0x14   : > { %2080 = sst [smem:[#allocation17_spill]] %s1044_s18  ;;  %p84_p7 = scmp.eq.s32.totalorder %s1028_s13, 1 }
  0x15   : > { %p90_p8 = scmp.eq.s32.totalorder %s717_s14, 1  ;;  %p718_p9 = scmp.ge.s32.totalorder %s977_s12, 1 }
  0x16   : > { %p97_p10 = scmp.lt.s32.totalorder %s977_s12, 3  ;;  %p1059_p11 = por %p84_p7, %p33_p0 }
  0x17   : > { %p1063_p12 = por %p90_p8, %p39_p3  ;;  %s2088_s1 = sld [smem:[#allocation54_spill]] }
  0x18   : > { %s2083_s21 = scalar_select %p1059_p11, 1, 0 }
  0x19   : > { %s2085_s22 = scalar_select %p1063_p12, 1, 0 }
  0x1a   : > { %2084 = sst [smem:[#allocation18_spill]] %s2083_s21  ;;  %p1067_p13 = pnand %p718_p9, %p97_p10 }
  0x1b   : > { %2086 = sst [smem:[#allocation19_spill]] %s2085_s22  ;;  %p806_p2 = scmp.lt.s32.totalorder %s977_s12, 2 }
  0x1c   : > { %p793_p1 = pneg %p1067_p13  ;;  %s120_s27 = sand.u32 1, %s973_s11  }
  0x1d   : > { %s109_s26 = sshll.u32 %s2088_s1, 4  ;;  %p1083_p3 = pnand %p806_p2, %p1046_p5  ;;  %s110_s26 = int_to_ptr.hbm [resolvable:$true] %s109_s26 }
  0x1e   : > { %p794_p7 = pnand %p793_p1, %p40_p4  ;;  %s721_s29 = sshll.u32 %s120_s27, 6 }
  0x1f   : > { %s983_s30 = smov [#allocation6]   ;;  %s783_s3 = sshll.u32 %s977_s12, 6 }
  0x20   : > { %796 = dma.hbm_to_smem (!%p794_p7), %s110_s26, 16, %s983_s30, [#allocation5]  }
  0x21   : > { %s124_s4 = scalar_lea.vmem [#allocation2], %s721_s29  ;;  %s2090_s0 = sld [smem:[#allocation53_spill]] }
  0x22   : > { %s132_s5 = sshll.u32 %s124_s4, 4  ;;  %s121_s16 = scalar_lea.sflag [#allocation3], %s120_s27  ;;  %s133_s5 = int_to_ptr.vmem [resolvable:$true] %s132_s5 }
  0x23   : > { %p877_p8 = pneg %p1083_p3 }
  0x27   : > { %s129_s8 = scalar_lea.hbm %s2090_s0, %s783_s3  ;;  %s880_s26 = scalar_lea.hbm %s2090_s0, 128 }
  0x28   : > { %s130_s14 = sshll.u32 %s129_s8, 4  ;;  %s131_s14 = int_to_ptr.hbm [resolvable:$true] %s130_s14 }
  0x29   : > { %s873_s17 = sshra.s32 %s131_s14, 4  ;;  %s874_s17 = int_to_ptr.hbm [resolvable:$true] %s873_s17 }
  0x2a   : > { %s875_s19 = scalar_lea.hbm %s874_s17, 64  ;;  %p881_p1 = scmp.lt.s32.totalorder %s874_s17, %s2090_s0 }
  0x2b   : > { %p876_p5 = scmp.ne.s32.totalorder %s874_s17, %s875_s19  ;;  %p882_p2 = scmp.lt.s32.totalorder %s880_s26, %s875_s19 }
  0x2d   : > { %p878_p9 = pnand %p877_p8, %p876_p5  ;;  %p883_p7 = por %p882_p2, %p881_p1 }
  0x2f   : > { %p879_p10 = pneg %p878_p9 }
  0x31   : > { %p884_p0 = pnand %p883_p7, %p879_p10 }
  0x33   : > { %887 = shalt.err (!%p884_p0)
}
  0x34   : > { %s984_s27 = smov 128   ;;  %s985_s3 = smov 8  }
  0x35   : > { %800 = dma.hbm_to_vmem [thread:$0]  (!%p1083_p3), %s131_s14, 1024, %s133_s5, %s121_s16, %s984_s27, %s984_s27, %s985_s3  }
  0x36   : > { %144 = sbr.rel (%p1067_p13) target bundleno = 363 (0x16b), region = 28 }
  0x3b   : > { %s1104_s4 = sand.u32 1, %s969_s10  }
  0x3c   : > { %s2023_s6 = sshll.u32 %s1104_s4, 6  ;;  %s147_s7 = scalar_lea.sflag [#allocation3], %s1104_s4 }
  0x3d   : > { %s1110_s8 = scalar_lea.vmem [#allocation2], %s2023_s6 }
  0x3e   : > { %2091 = sst [smem:[#allocation20_spill]] %s1110_s8 }
  0x3f   : > { %952 = dma.done.wait (%p1052_p6), %s147_s7, 1024  }
  0x40   : > { %954 = vsyncadd (%p1052_p6), %s147_s7, 4294966272 }
  0x41   : > { %956 = dma.done.wait (%p40_p4), [#allocation5], 16  }
  0x42   : > { %958 = vsyncadd (%p40_p4), [#allocation5], 4294967280 }
  0x43   : > { %161 = sfence }
  0x44   : > { %s1120_s23 = sld [smem:[#allocation6]] }
  0x45   : > { %s1122_s28 = sld [smem:[#allocation6 + $0x1]] }
  0x46   : > { %s1124_s5 = sld [smem:[#allocation6 + $0x2]] }
  0x47   : > { %s1126_s14 = sld [smem:[#allocation6 + $0x3]] }
  0x48   : > { %s1128_s16 = sld [smem:[#allocation6 + $0x4]] }
  0x49   : > { %s1130_s17 = sld [smem:[#allocation6 + $0x5]] }
  0x4a   : > { %s1132_s20 = sld [smem:[#allocation6 + $0x6]] }
  0x4b   : > { %s1134_s19 = sld [smem:[#allocation6 + $0x7]] }
  0x4c   : > { %2092 = sst [smem:[#allocation21_spill]] %s1124_s5 }
  0x4d   : > { %2093 = sst [smem:[#allocation22_spill]] %s1126_s14 }
  0x4e   : > { %2094 = sst [smem:[#allocation23_spill]] %s1128_s16 }
  0x4f   : > { %2095 = sst [smem:[#allocation24_spill]] %s1130_s17 }
  0x50   : > { %s1136_s24 = sld [smem:[#allocation6 + $0x8]] }
  0x51   : > { %s1138_s25 = sld [smem:[#allocation6 + $0x9]] }
  0x52   : > { %s1140_s26 = sld [smem:[#allocation6 + $0xa]] }
  0x53   : > { %s1142_s29 = sld [smem:[#allocation6 + $0xb]] }
  0x54   : > { %s1144_s30 = sld [smem:[#allocation6 + $0xc]] }
  0x55   : > { %s1146_s27 = sld [smem:[#allocation6 + $0xd]] }
  0x56   : > { %s1148_s3 = sld [smem:[#allocation6 + $0xe]] }
  0x57   : > { %s1150_s7 = sld [smem:[#allocation6 + $0xf]] }
  0x58   : > { %s1152_s6 = sld [smem:[#allocation6 + $0x10]] }
  0x59   : > { %s1154_s0 = sld [smem:[#allocation6 + $0x11]] }
  0x5a   : > { %s1156_s1 = sld [smem:[#allocation6 + $0x12]] }
  0x5b   : > { %s1158_s18 = sld [smem:[#allocation6 + $0x13]] }
  0x5c   : > { %2096 = sst [smem:[#allocation25_spill]] %s1148_s3 }
  0x5d   : > { %2097 = sst [smem:[#allocation26_spill]] %s1150_s7 }
  0x5e   : > { %2098 = sst [smem:[#allocation27_spill]] %s1152_s6 }
  0x5f   : > { %2099 = sst [smem:[#allocation28_spill]] %s1154_s0 }
  0x60   : > { %2100 = sst [smem:[#allocation29_spill]] %s1156_s1 }
  0x61   : > { %2101 = sst [smem:[#allocation30_spill]] %s1158_s18 }
  0x62   : > { %s1160_s11 = sld [smem:[#allocation6 + $0x14]] }
  0x63   : > { %s1162_s10 = sld [smem:[#allocation6 + $0x15]] }
  0x64   : > { %s1164_s15 = sld [smem:[#allocation6 + $0x16]] }
  0x65   : > { %s1166_s12 = sld [smem:[#allocation6 + $0x17]] }
  0x66   : > { %s1168_s22 = sld [smem:[#allocation6 + $0x18]] }
  0x67   : > { %s1170_s9 = sld [smem:[#allocation6 + $0x19]] }
  0x68   : > { %2102 = sst [smem:[#allocation31_spill]] %s1160_s11 }
  0x69   : > { %2103 = sst [smem:[#allocation32_spill]] %s1162_s10 }
  0x6a   : > { %2104 = sst [smem:[#allocation33_spill]] %s1164_s15 }
  0x6b   : > { %2105 = sst [smem:[#allocation34_spill]] %s1166_s12 }
  0x6c   : > { %2106 = sst [smem:[#allocation35_spill]] %s1168_s22 }
  0x6d   : > { %2107 = sst [smem:[#allocation36_spill]] %s1170_s9 }
  0x6e   : > { %s1172_s2 = sld [smem:[#allocation6 + $0x1a]] }
  0x6f   : > { %s1174_s21 = sld [smem:[#allocation6 + $0x1b]] }
  0x70   : > { %s1176_s13 = sld [smem:[#allocation6 + $0x1c]] }
  0x71   : > { %s1178_s1 = sld [smem:[#allocation6 + $0x1d]] }
  0x72   : > { %s1180_s18 = sld [smem:[#allocation6 + $0x1e]] }
  0x73   : > { %s1182_s11 = sld [smem:[#allocation6 + $0x1f]] }
  0x74   : > { %2108 = sst [smem:[#allocation37_spill]] %s1172_s2 }
  0x75   : > { %2109 = sst [smem:[#allocation38_spill]] %s1174_s21 }
  0x76   : > { %2110 = sst [smem:[#allocation39_spill]] %s1176_s13 }
  0x77   : > { %2111 = sst [smem:[#allocation40_spill]] %s1178_s1 }
  0x78   : > { %2112 = sst [smem:[#allocation41_spill]] %s1180_s18 }
  0x79   : > { %2113 = sst [smem:[#allocation42_spill]] %s1182_s11 }
  0x7a   : > { %s1184_s10 = sld [smem:[#allocation6 + $0x20]] }
  0x7b   : > { %s1186_s15 = sld [smem:[#allocation6 + $0x21]] }
  0x7c   : > { %s1188_s12 = sld [smem:[#allocation6 + $0x22]] }
  0x7d   : > { %s1190_s9 = sld [smem:[#allocation6 + $0x23]] }
  0x7e   : > { %s1192_s2 = sld [smem:[#allocation6 + $0x24]] }
  0x7f   : > { %s1194_s21 = sld [smem:[#allocation6 + $0x25]] }
  0x80   : > { %2114 = sst [smem:[#allocation43_spill]] %s1184_s10 }
  0x81   : > { %2115 = sst [smem:[#allocation44_spill]] %s1186_s15 }
  0x82   : > { %2116 = sst [smem:[#allocation45_spill]] %s1188_s12 }
  0x83   : > { %2117 = sst [smem:[#allocation46_spill]] %s1190_s9 }
  0x84   : > { %2118 = sst [smem:[#allocation47_spill]] %s1192_s2 }
  0x85   : > { %2119 = sst [smem:[#allocation48_spill]] %s1194_s21 }
  0x86   : > { %s1196_s13 = sld [smem:[#allocation6 + $0x26]] }
  0x87   : > { %s1198_s1 = sld [smem:[#allocation6 + $0x27]] }
  0x88   : > { %s1200_s22 = sld [smem:[#allocation6 + $0x28]] }
  0x89   : > { %s1202_s11 = sld [smem:[#allocation6 + $0x29]] }
  0x8a   : > { %s1204_s10 = sld [smem:[#allocation6 + $0x2a]] }
  0x8b   : > { %s1206_s15 = sld [smem:[#allocation6 + $0x2b]] }
  0x8c   : > { %2120 = sst [smem:[#allocation49_spill]] %s1196_s13 }
  0x8d   : > { %2121 = sst [smem:[#allocation50_spill]] %s1198_s1  ;;  %s2124_s1 = sshll.u32 %s1104_s4, 6 }
  0x8e   : > { %2122 = sst [smem:[#allocation51_spill]] %s1200_s22  ;;  %s1222_s22 = scalar_lea.vmem [#allocation7], %s2124_s1 }
  0x8f   : > { %2123 = sst [smem:[#allocation52_spill]] %s1202_s11  ;;  %s1224_s11 = smov 0  }
  0x90   : > { %s1208_s12 = sld [smem:[#allocation6 + $0x2c]] }
  0x91   : > { %s1210_s18 = sld [smem:[#allocation6 + $0x2d]] }
  0x92   : > { %s1212_s9 = sld [smem:[#allocation6 + $0x2e]] }
  0x93   : > { %s1214_s2 = sld [smem:[#allocation6 + $0x2f]] }
  0x94   : > { %s1216_s21 = sld [smem:[#allocation6 + $0x30]] }
  0x95   : > { %s1218_s13 = sld [smem:[#allocation6 + $0x31]] }
  0x96 LB: >> { %s2125_s5 = sld [smem:[#allocation21_spill]]  ;;  %v1230_v0 = vstv %s1120_s23  ;;  %v1233_v1 = vstv %s1122_s28  ;;  %s2043_s1 = sshll.u32 %s981_s11, 5  ;;  %v1249_v6 = vstv %s1132_s20  ;;  %v1252_v7 = vstv %s1134_s19  ;;  %s981_s11 = sphi %s1224_s11, %s235_s11  }
  0x97   : >> { %s2126_s14 = sld [smem:[#allocation22_spill]]  ;;  %v1255_v8 = vstv %s1136_s24  ;;  %v1258_v9 = vstv %s1138_s25  ;;  %v1266_v10 = vstv %s1140_s26  ;;  %v1269_v11 = vstv %s1142_s29 }
  0x98   : >> { %s2127_s16 = sld [smem:[#allocation23_spill]]  ;;  %v1272_v12 = vstv %s1144_s30  ;;  %v1275_v13 = vstv %s1146_s27 }
  0x99   : >> { %s2128_s17 = sld [smem:[#allocation24_spill]] }
  0x9a   : >> { %s2129_s8 = sld [smem:[#allocation20_spill]] }
  0x9b   : >> { %s2130_s3 = sld [smem:[#allocation25_spill]] }
  0x9c   : >> { %v1236_v2 = vstv %s2125_s5  ;;  %s2131_s7 = sld [smem:[#allocation26_spill]] }
  0x9d   : >> { %v1239_v3 = vstv %s2126_s14  ;;  %s2132_s6 = sld [smem:[#allocation27_spill]] }
  0x9e   : >> { %v1242_v4 = vstv %s2127_s16  ;;  %s2133_s0 = sld [smem:[#allocation28_spill]] }
  0x9f   : >> { %v1245_v5 = vstv %s2128_s17  ;;  %s2166_s14 = sld [smem:[#allocation47_spill]] }
  0xa0   : >> { %s1263_s5 = scalar_lea.vmem %s2129_s8, %s2043_s1  ;;  %s2055_s1 = smov 2  }
  0xa1   : >> { %v1278_v14 = vld [vmem:[%s1263_s5 + $0x10] sm:$0xff]  ;;  %v1281_v15 = vstv %s2130_s3  ;;  %v1294_v18 = vld [vmem:[%s1263_s5] sm:$0xff]  ;;  %v1323_v24 = vld [vmem:[%s1263_s5 + $0x18] sm:$0xff]  ;;  %s2136_s3 = smov 2   ;;  %s2165_s8 = sld [smem:[#allocation46_spill]] }
  0xa2   : >> { %v1284_v16 = vstv %s2131_s7  ;;  %vm244_vm0 = vcmp.eq.s32.totalorder %v1278_v14, 0  ;;  %vm2038_vm1 = vcmp.eq.s32.totalorder %v1278_v14, 1  ;;  %vm2036_vm2 = vcmp.eq.s32.totalorder %v1278_v14, 2  ;;  %v1389_v42 = vld [vmem:[%s1263_s5 + $0x8] sm:$0xff]  ;;  %s2134_s5 = sld [smem:[#allocation29_spill]] }
  0xa3   : >> { %v1287_v17 = vstv %s2132_s6  ;;  %vm2035_vm3 = vcmp.eq.s32.totalorder %v1278_v14, 3  ;;  %v249_v19 = vsel %vm244_vm0, %v1230_v0, 0.0  ;;  %vm2037_vm4 = vcmp.eq.s32.totalorder %v1278_v14, 4  ;;  %s2068_s6 = smov 1   ;;  %s2163_s7 = sld [smem:[#allocation45_spill]] }
  0xa4   : >> { %vm2039_vm5 = vcmp.eq.s32.totalorder %v1278_v14, 5  ;;  %vm2040_vm6 = vcmp.eq.s32.totalorder %v1278_v14, 6  ;;  %v278_v20 = vsel %vm2038_vm1, %v1233_v1, %v249_v19  ;;  %vm2041_vm7 = vcmp.eq.s32.totalorder %v1278_v14, 7  ;;  %s2170_s16 = sld [smem:[#allocation49_spill]] }
  0xa5   : >> { %vm2042_vm8 = vcmp.eq.s32.totalorder %v1278_v14, 8  ;;  %vm2044_vm9 = vcmp.eq.s32.totalorder %v1278_v14, 9  ;;  %v307_v21 = vsel %vm2036_vm2, %v1236_v2, %v278_v20  ;;  %vm2067_vm10 = vcmp.eq.s32.totalorder %v1294_v18, 0  ;;  %s2171_s17 = sld [smem:[#allocation50_spill]] }
  0xa6   : >> { %vm2064_vm11 = vcmp.eq.s32.totalorder %v1294_v18, 1  ;;  %vm2062_vm12 = vcmp.eq.s32.totalorder %v1294_v18, 2  ;;  %v336_v22 = vsel %vm2035_vm3, %v1239_v3, %v307_v21  ;;  %v247_v23 = vsel %vm2067_vm10, %v1230_v0, 0.0 }
  0xa7   : >> { %vm2065_vm13 = vcmp.eq.s32.totalorder %v1294_v18, 3  ;;  %vm2054_vm14 = vcmp.eq.s32.totalorder %v1294_v18, 4  ;;  %v365_v25 = vsel %vm2037_vm4, %v1242_v4, %v336_v22  ;;  %v276_v26 = vsel %vm2064_vm11, %v1233_v1, %v247_v23 }
  0xa8   : >> { %vm2047_vm15 = vcmp.eq.s32.totalorder %v1294_v18, 5  ;;  %vm2045_vm3 = vcmp.eq.s32.totalorder %v1294_v18, 6  ;;  %v394_v27 = vsel %vm2039_vm5, %v1245_v5, %v365_v25  ;;  %v305_v28 = vsel %vm2062_vm12, %v1236_v2, %v276_v26 }
  0xa9   : >> { %vm2046_vm2 = vcmp.eq.s32.totalorder %v1294_v18, 7  ;;  %vm2049_vm4 = vcmp.eq.s32.totalorder %v1294_v18, 8  ;;  %v423_v29 = vsel %vm2040_vm6, %v1249_v6, %v394_v27  ;;  %v334_v30 = vsel %vm2065_vm13, %v1239_v3, %v305_v28 }
  0xaa   : >> { %vm2052_vm1 = vcmp.eq.s32.totalorder %v1294_v18, 9  ;;  %vm2063_vm5 = vcmp.eq.s32.totalorder %v1323_v24, 0  ;;  %v452_v31 = vsel %vm2041_vm7, %v1252_v7, %v423_v29  ;;  %v363_v32 = vsel %vm2054_vm14, %v1242_v4, %v334_v30 }
  0xab   : >> { %v250_v33 = vsel %vm2063_vm5, %v1230_v0, 0.0  ;;  %vm2066_vm6 = vcmp.eq.s32.totalorder %v1323_v24, 1  ;;  %v481_v34 = vsel %vm2042_vm8, %v1255_v8, %v452_v31  ;;  %v392_v35 = vsel %vm2047_vm15, %v1245_v5, %v363_v32 }
  0xac   : >> { %v279_v36 = vsel %vm2066_vm6, %v1233_v1, %v250_v33  ;;  %vm2051_vm7 = vcmp.eq.s32.totalorder %v1323_v24, 2  ;;  %v510_v37 = vsel %vm2044_vm9, %v1258_v9, %v481_v34  ;;  %v421_v38 = vsel %vm2045_vm3, %v1249_v6, %v392_v35 }
  0xad   : >> { %v308_v39 = vsel %vm2051_vm7, %v1236_v2, %v279_v36  ;;  %vm2048_vm8 = vcmp.eq.s32.totalorder %v1323_v24, 3  ;;  %538 = vrot.lane.b32.xlu1 %v510_v37, %s2055_s1  ;;  %v450_v40 = vsel %vm2046_vm2, %v1252_v7, %v421_v38  ;;  %vm2050_vm9 = vcmp.eq.s32.totalorder %v1323_v24, 4 }
  0xae   : >> { %v337_v41 = vsel %vm2048_vm8, %v1239_v3, %v308_v39  ;;  %vm2053_vm3 = vcmp.eq.s32.totalorder %v1323_v24, 5  ;;  %v479_v43 = vsel %vm2049_vm4, %v1255_v8, %v450_v40  ;;  %vm2058_vm2 = vcmp.eq.s32.totalorder %v1323_v24, 6 }
  0xaf   : >> { %v366_v44 = vsel %vm2050_vm9, %v1242_v4, %v337_v41  ;;  %vm2057_vm15 = vcmp.eq.s32.totalorder %v1323_v24, 7  ;;  %v508_v45 = vsel %vm2052_vm1, %v1258_v9, %v479_v43  ;;  %vm2060_vm8 = vcmp.eq.s32.totalorder %v1323_v24, 8 }
  0xb0   : >> { %v395_v46 = vsel %vm2053_vm3, %v1245_v5, %v366_v44  ;;  %vm506_vm4 = vcmp.eq.s32.totalorder %v1323_v24, 9  ;;  %534 = vrot.lane.b32.xlu0 %v508_v45, %s2055_s1  ;;  %vm2059_vm9 = vcmp.eq.s32.totalorder %v1389_v42, 0  ;;  %vm2061_vm7 = vcmp.eq.s32.totalorder %v1389_v42, 1  ;;  %s2135_s1 = sld [smem:[#allocation30_spill]] }
  0xb1   : >> { %v424_v47 = vsel %vm2058_vm2, %v1249_v6, %v395_v46  ;;  %vm301_vm1 = vcmp.eq.s32.totalorder %v1389_v42, 2  ;;  %v248_v49 = vsel %vm2059_vm9, %v1230_v0, 0.0  ;;  %vm330_vm3 = vcmp.eq.s32.totalorder %v1389_v42, 3 }
  0xb2   : >> { %v453_v48 = vsel %vm2057_vm15, %v1252_v7, %v424_v47  ;;  %vm359_vm14 = vcmp.eq.s32.totalorder %v1389_v42, 4  ;;  %v277_v51 = vsel %vm2061_vm7, %v1233_v1, %v248_v49  ;;  %vm388_vm15 = vcmp.eq.s32.totalorder %v1389_v42, 5 }
  0xb3   : >> { %v482_v50 = vsel %vm2060_vm8, %v1255_v8, %v453_v48  ;;  %vm417_vm2 = vcmp.eq.s32.totalorder %v1389_v42, 6  ;;  %v306_v53 = vsel %vm301_vm1, %v1236_v2, %v277_v51  ;;  %vm446_vm9 = vcmp.eq.s32.totalorder %v1389_v42, 7 }
  0xb4   : >> { %v511_v52 = vsel %vm506_vm4, %v1258_v9, %v482_v50  ;;  %vm475_vm8 = vcmp.eq.s32.totalorder %v1389_v42, 8  ;;  %v335_v54 = vsel %vm330_vm3, %v1239_v3, %v306_v53  ;;  %vm2070_vm7 = vcmp.eq.s32.totalorder %v1389_v42, 9 }
  0xb5   : >> { %v252_v55 = vsel %vm2067_vm10, %v1266_v10, 0.0  ;;  %v454_v56 = vstv %s2133_s0  ;;  %540 = vrot.lane.b32.xlu1 %v511_v52, %s2136_s3  ;;  %v364_v57 = vsel %vm359_vm14, %v1242_v4, %v335_v54  ;;  %v483_v59 = vstv %s2134_s5  ;;  %s2160_s5 = sld [smem:[#allocation43_spill]] }
  0xb6   : >> { %v281_v58 = vsel %vm2064_vm11, %v1269_v11, %v252_v55  ;;  %v1455_v60 = vstv %s2135_s1  ;;  %v393_v61 = vsel %vm388_vm15, %v1245_v5, %v364_v57  ;;  %v255_v63 = vsel %vm2063_vm5, %v1266_v10, 0.0  ;;  %s2150_s1 = sld [smem:[#allocation41_spill]] }
  0xb7   : >> { %v310_v62 = vsel %vm2062_vm12, %v1272_v12, %v281_v58  ;;  %v254_v0 = vsel %vm244_vm0, %v1266_v10, 0.0  ;;  %v422_v1 = vsel %vm417_vm2, %v1249_v6, %v393_v61  ;;  %v284_v3 = vsel %vm2066_vm6, %v1269_v11, %v255_v63  ;;  %s2161_s0 = sld [smem:[#allocation44_spill]] }
  0xb8   : >> { %v339_v2 = vsel %vm2065_vm13, %v1275_v13, %v310_v62  ;;  %vm2137_vm12 = vcmp.eq.s32.totalorder %v1278_v14, 1  ;;  %v451_v5 = vsel %vm446_vm9, %v1252_v7, %v422_v1  ;;  %vm2138_vm5 = vcmp.eq.s32.totalorder %v1294_v18, 4 }
  0xb9   : >> { %v283_v4 = vsel %vm2137_vm12, %v1269_v11, %v254_v0  ;;  %v368_v6 = vsel %vm2138_vm5, %v1281_v15, %v339_v2  ;;  %vm2139_vm11 = vcmp.eq.s32.totalorder %v1323_v24, 2  ;;  %vm2140_vm13 = vcmp.eq.s32.totalorder %v1278_v14, 2 }
  0xba   : >> { %v313_v19 = vsel %vm2139_vm11, %v1272_v12, %v284_v3  ;;  %v312_v20 = vsel %vm2140_vm13, %v1272_v12, %v283_v4  ;;  %v480_v21 = vsel %vm475_vm8, %v1255_v8, %v451_v5  ;;  %vm2141_vm12 = vcmp.eq.s32.totalorder %v1294_v18, 5 }
  0xbb   : >> { %v397_v7 = vsel %vm2141_vm12, %v1284_v16, %v368_v6  ;;  %vm2142_vm6 = vcmp.eq.s32.totalorder %v1323_v24, 3  ;;  %vm2143_vm5 = vcmp.eq.s32.totalorder %v1278_v14, 3  ;;  %v509_v25 = vsel %vm2070_vm7, %v1258_v9, %v480_v21 }
  0xbc   : >> { %v342_v22 = vsel %vm2142_vm6, %v1275_v13, %v313_v19  ;;  %v341_v23 = vsel %vm2143_vm5, %v1275_v13, %v312_v20  ;;  %vm2144_vm11 = vcmp.eq.s32.totalorder %v1294_v18, 6  ;;  %vm2145_vm13 = vcmp.eq.s32.totalorder %v1323_v24, 4  ;;  %536 = vrot.lane.b32.xlu0 %v509_v25, %s2136_s3  ;;  %s2158_s3 = sld [smem:[#allocation42_spill]] }
  0xbd   : >> { %v426_v8 = vsel %vm2144_vm11, %v1287_v17, %v397_v7  ;;  %v371_v26 = vsel %vm2145_vm13, %v1281_v15, %v342_v22  ;;  %vm2146_vm12 = vcmp.eq.s32.totalorder %v1278_v14, 4  ;;  %vm2147_vm6 = vcmp.eq.s32.totalorder %v1294_v18, 7 }
  0xbe   : >> { %v370_v27 = vsel %vm2146_vm12, %v1281_v15, %v341_v23  ;;  %v455_v28 = vsel %vm2147_vm6, %v454_v56, %v426_v8  ;;  %vm2148_vm5 = vcmp.eq.s32.totalorder %v1323_v24, 5  ;;  %vm2149_vm11 = vcmp.eq.s32.totalorder %v1278_v14, 5 }
  0xbf   : >> { %v400_v9 = vsel %vm2148_vm5, %v1284_v16, %v371_v26  ;;  %v399_v29 = vsel %vm2149_vm11, %v1284_v16, %v370_v27  ;;  %vm2151_vm13 = vcmp.eq.s32.totalorder %v1389_v42, 0  ;;  %vm2152_vm12 = vcmp.eq.s32.totalorder %v1294_v18, 8 }
  0xc0   : >> { %v253_v30 = vsel %vm2151_vm13, %v1266_v10, 0.0  ;;  %v484_v31 = vsel %vm2152_vm12, %v483_v59, %v455_v28  ;;  %vm2153_vm10 = vcmp.eq.s32.totalorder %v1323_v24, 6  ;;  %vm2154_vm6 = vcmp.eq.s32.totalorder %v1278_v14, 6 }
  0xc1   : >> { %v429_v32 = vsel %vm2153_vm10, %v1287_v17, %v400_v9  ;;  %v428_v33 = vsel %vm2154_vm6, %v1287_v17, %v399_v29  ;;  %vm2155_vm5 = vcmp.eq.s32.totalorder %v1389_v42, 1  ;;  %vm2156_vm11 = vcmp.eq.s32.totalorder %v1294_v18, 9 }
  0xc2   : >> { %v282_v34 = vsel %vm2155_vm5, %v1269_v11, %v253_v30  ;;  %v513_v35 = vsel %vm2156_vm11, %v1455_v60, %v484_v31  ;;  %vm2157_vm13 = vcmp.eq.s32.totalorder %v1323_v24, 7  ;;  %vm2159_vm12 = vcmp.eq.s32.totalorder %v1278_v14, 7 }
  0xc3   : >> { %v458_v10 = vsel %vm2157_vm13, %v454_v56, %v429_v32  ;;  %v457_v36 = vsel %vm2159_vm12, %v454_v56, %v428_v33  ;;  %v311_v37 = vsel %vm301_vm1, %v1272_v12, %v282_v34  ;;  %547 = vrot.lane.b32.xlu2 %v513_v35, %s2068_s6  ;;  %vm2162_vm10 = vcmp.eq.s32.totalorder %v1323_v24, 8  ;;  %s2168_s6 = sld [smem:[#allocation48_spill]] }
  0xc4   : >> { %v487_v11 = vsel %vm2162_vm10, %v483_v59, %v458_v10  ;;  %vm2164_vm6 = vcmp.eq.s32.totalorder %v1278_v14, 8  ;;  %v340_v39 = vsel %vm330_vm3, %v1275_v13, %v311_v37  ;;  %v1559_v40 = vstv %s2150_s1  ;;  %s2169_s1 = smov 1  }
  0xc5   : >> { %v486_v38 = vsel %vm2164_vm6, %v483_v59, %v457_v36  ;;  %v516_v12 = vsel %vm506_vm4, %v1455_v60, %v487_v11  ;;  %vm2167_vm5 = vcmp.eq.s32.totalorder %v1278_v14, 9  ;;  %v369_v43 = vsel %vm359_vm14, %v1281_v15, %v340_v39 }
  0xc6   : >> { %v515_v41 = vsel %vm2167_vm5, %v1455_v60, %v486_v38  ;;  %v264_v13 = vsel %vm244_vm0, %v1559_v40, 0.0  ;;  %553 = vrot.lane.b32.xlu1 %v516_v12, %s2169_s1  ;;  %v398_v44 = vsel %vm388_vm15, %v1284_v16, %v369_v43  ;;  %v1578_v45 = vstv %s2158_s3  ;;  %s2236_s3 = sld [smem:[#allocation34_spill]] }
  0xc7   : >> { %v1581_v46 = vstv %s2160_s5  ;;  %v1584_v47 = vstv %s2161_s0  ;;  %v427_v15 = vsel %vm417_vm2, %v1287_v17, %v398_v44  ;;  %vm2172_vm11 = vcmp.eq.s32.totalorder %v1278_v14, 1  ;;  %s2174_s0 = sld [smem:[#allocation51_spill]]  ;;  %551 = vrot.lane.b32.xlu0 %v515_v41, %s2169_s1 }
  0xc8   : >> { %v293_v48 = vsel %vm2172_vm11, %v1578_v45, %v264_v13  ;;  %v1593_v49 = vstv %s2163_s7  ;;  %v1596_v50 = vstv %s2165_s8  ;;  %v456_v16 = vsel %vm446_vm9, %v454_v56, %v427_v15  ;;  %s988_s8 = smov 127   ;;  %s2234_s7 = sld [smem:[#allocation33_spill]] }
  0xc9   : >> { %vm2173_vm13 = vcmp.eq.s32.totalorder %v1278_v14, 2  ;;  %v1604_v52 = vstv %s2166_s14  ;;  %v1607_v53 = vstv %s2168_s6  ;;  %v485_v17 = vsel %vm475_vm8, %v483_v59, %v456_v16  ;;  %s2177_s6 = sld [smem:[#allocation52_spill]]  ;;  %s989_s14 = smov 126  }
  0xca   : >> { %v322_v51 = vsel %vm2173_vm13, %v1581_v46, %v293_v48  ;;  %vm2175_vm12 = vcmp.eq.s32.totalorder %v1278_v14, 3  ;;  %v1616_v55 = vstv %s2170_s16  ;;  %v1619_v56 = vstv %s2171_s17  ;;  %s2227_s16 = sld [smem:[#allocation31_spill]] }
  0xcb   : >> { %v351_v54 = vsel %vm2175_vm12, %v1584_v47, %v322_v51  ;;  %v514_v57 = vsel %vm2070_vm7, %v1455_v60, %v485_v17  ;;  %vm2176_vm10 = vcmp.eq.s32.totalorder %v1278_v14, 4  ;;  %vm2178_vm6 = vcmp.eq.s32.totalorder %v1389_v42, 0  ;;  %s2230_s17 = sld [smem:[#allocation32_spill]] }
  0xcc   : >> { %v380_v58 = vsel %vm2176_vm10, %v1593_v49, %v351_v54  ;;  %v263_v59 = vsel %vm2178_vm6, %v1559_v40, 0.0  ;;  %vm2179_vm5 = vcmp.eq.s32.totalorder %v1294_v18, 0  ;;  %vm2180_vm11 = vcmp.eq.s32.totalorder %v1278_v14, 5  ;;  %549 = vrot.lane.b32.xlu2 %v514_v57, %s2169_s1  ;;  %s2238_s5 = sld [smem:[#allocation35_spill]] }
  0xcd   : >> { %v262_v61 = vsel %vm2179_vm5, %v1559_v40, 0.0  ;;  %v409_v62 = vsel %vm2180_vm11, %v1596_v50, %v380_v58  ;;  %vm2181_vm13 = vcmp.eq.s32.totalorder %v1389_v42, 1  ;;  %vm2182_vm12 = vcmp.eq.s32.totalorder %v1294_v18, 1  ;;  %s2240_s1 = sld [smem:[#allocation36_spill]] }
  0xce   : >> { %v292_v60 = vsel %vm2181_vm13, %v1578_v45, %v263_v59  ;;  %v291_v63 = vsel %vm2182_vm12, %v1578_v45, %v262_v61  ;;  %v266_v0 = vstv %s2174_s0  ;;  %vm2183_vm10 = vcmp.eq.s32.totalorder %v1278_v14, 6  ;;  %s2244_s0 = sld [smem:[#allocation37_spill]] }
  0xcf   : >> { %v438_v1 = vsel %vm2183_vm10, %v1604_v52, %v409_v62  ;;  %v321_v2 = vsel %vm301_vm1, %v1581_v46, %v292_v60  ;;  %vm2184_vm6 = vcmp.eq.s32.totalorder %v1294_v18, 2  ;;  %vm2185_vm5 = vcmp.eq.s32.totalorder %v1389_v42, 0 }
  0xd0   : >> { %v320_v3 = vsel %vm2184_vm6, %v1581_v46, %v291_v63  ;;  %v268_v4 = vsel %vm2185_vm5, %v266_v0, 0.0  ;;  %vm2186_vm11 = vcmp.eq.s32.totalorder %v1278_v14, 7  ;;  %v350_v6 = vsel %vm330_vm3, %v1584_v47, %v321_v2 }
  0xd1   : >> { %v467_v5 = vsel %vm2186_vm11, %v1607_v53, %v438_v1  ;;  %vm2187_vm13 = vcmp.eq.s32.totalorder %v1294_v18, 3  ;;  %v295_v20 = vstv %s2177_s6  ;;  %vm2188_vm12 = vcmp.eq.s32.totalorder %v1278_v14, 8  ;;  %s2248_s6 = sld [smem:[#allocation38_spill]] }
  0xd2   : >> { %v349_v19 = vsel %vm2187_vm13, %v1584_v47, %v320_v3  ;;  %v496_v21 = vsel %vm2188_vm12, %v1616_v55, %v467_v5  ;;  %v379_v7 = vsel %vm359_vm14, %v1593_v49, %v350_v6  ;;  %vm2189_vm10 = vcmp.eq.s32.totalorder %v1294_v18, 4 }
  0xd3   : >> { %v378_v22 = vsel %vm2189_vm10, %v1593_v49, %v349_v19  ;;  %vm2190_vm6 = vcmp.eq.s32.totalorder %v1389_v42, 1  ;;  %vm2191_vm5 = vcmp.eq.s32.totalorder %v1278_v14, 9  ;;  %v408_v8 = vsel %vm388_vm15, %v1596_v50, %v379_v7 }
  0xd4   : >> { %v297_v23 = vsel %vm2190_vm6, %v295_v20, %v268_v4  ;;  %v525_v25 = vsel %vm2191_vm5, %v1619_v56, %v496_v21  ;;  %vm2192_vm11 = vcmp.eq.s32.totalorder %v1294_v18, 5  ;;  %v324_v27 = vstv %s1204_s10 }
  0xd5   : >> { %v407_v26 = vsel %vm2192_vm11, %v1596_v50, %v378_v22  ;;  %572 = vrot.lane.b32.xlu1 %v525_v25, %s988_s8  ;;  %v437_v28 = vsel %vm417_vm2, %v1604_v52, %v408_v8  ;;  %vm2193_vm13 = vcmp.eq.s32.totalorder %v1294_v18, 6  ;;  %v326_v29 = vsel %vm301_vm1, %v324_v27, %v297_v23 }
  0xd6   : >> { %v436_v9 = vsel %vm2193_vm13, %v1604_v52, %v407_v26  ;;  %v353_v30 = vstv %s1206_s15  ;;  %v466_v31 = vsel %vm446_vm9, %v1607_v53, %v437_v28  ;;  %vm2194_vm12 = vcmp.eq.s32.totalorder %v1294_v18, 7 }
  0xd7   : >> { %v465_v32 = vsel %vm2194_vm12, %v1607_v53, %v436_v9  ;;  %v355_v33 = vsel %vm330_vm3, %v353_v30, %v326_v29  ;;  %v382_v34 = vstv %s1208_s12  ;;  %v495_v35 = vsel %vm475_vm8, %v1616_v55, %v466_v31 }
  0xd8   : >> { %vm2195_vm10 = vcmp.eq.s32.totalorder %v1294_v18, 8  ;;  %v384_v36 = vsel %vm359_vm14, %v382_v34, %v355_v33  ;;  %v411_v37 = vstv %s1210_s18  ;;  %v524_v11 = vsel %vm2070_vm7, %v1619_v56, %v495_v35 }
  0xd9   : >> { %v494_v10 = vsel %vm2195_vm10, %v1616_v55, %v465_v32  ;;  %vm2196_vm6 = vcmp.eq.s32.totalorder %v1294_v18, 9  ;;  %v413_v39 = vsel %vm388_vm15, %v411_v37, %v384_v36  ;;  %v440_v12 = vstv %s1212_s9  ;;  %570 = vrot.lane.b32.xlu0 %v524_v11, %s988_s8 }
  0xda   : >> { %v523_v38 = vsel %vm2196_vm6, %v1619_v56, %v494_v10  ;;  %v442_v41 = vsel %vm417_vm2, %v440_v12, %v413_v39  ;;  %v469_v43 = vstv %s1214_s2  ;;  %v498_v13 = vstv %s1216_s21 }
  0xdb   : >> { %568 = vrot.lane.b32.xlu2 %v523_v38, %s988_s8  ;;  %vm2197_vm5 = vcmp.eq.s32.totalorder %v1294_v18, 0  ;;  %v471_v15 = vsel %vm446_vm9, %v469_v43, %v442_v41  ;;  %v527_v48 = vstv %s1218_s13  ;;  %vm2198_vm11 = vcmp.eq.s32.totalorder %v1294_v18, 1 }
  0xdc   : >> { %v267_v44 = vsel %vm2197_vm5, %v266_v0, 0.0  ;;  %vm2199_vm13 = vcmp.eq.s32.totalorder %v1323_v24, 0  ;;  %v500_v17 = vsel %vm475_vm8, %v498_v13, %v471_v15  ;;  %vm2200_vm12 = vcmp.eq.s32.totalorder %v1294_v18, 2 }
  0xdd   : >> { %v296_v16 = vsel %vm2198_vm11, %v295_v20, %v267_v44  ;;  %v270_v51 = vsel %vm2199_vm13, %v266_v0, 0.0  ;;  %vm2201_vm10 = vcmp.eq.s32.totalorder %v1323_v24, 1  ;;  %vm2202_vm6 = vmmov %vm2199_vm13  ;;  %v529_v59 = vsel %vm2070_vm7, %v527_v48, %v500_v17 }
  0xde   : >> { %v325_v54 = vsel %vm2200_vm12, %v324_v27, %v296_v16  ;;  %v299_v57 = vsel %vm2201_vm10, %v295_v20, %v270_v51  ;;  %v265_v58 = vsel %vm2202_vm6, %v1559_v40, 0.0  ;;  %vm2203_vm5 = vcmp.eq.s32.totalorder %v1294_v18, 3  ;;  %vm2205_vm13 = vmmov %vm2201_vm10  ;;  %587 = vrot.lane.b32.xlu1 %v529_v59, %s989_s14 }
  0xdf   : >> { %v354_v61 = vsel %vm2203_vm5, %v353_v30, %v325_v54  ;;  %vm2204_vm11 = vcmp.eq.s32.totalorder %v1323_v24, 2  ;;  %v294_v60 = vsel %vm2205_vm13, %v1578_v45, %v265_v58  ;;  %vm2206_vm12 = vcmp.eq.s32.totalorder %v1294_v18, 4 }
  0xe0   : >> { %v328_v62 = vsel %vm2204_vm11, %v324_v27, %v299_v57  ;;  %v383_v63 = vsel %vm2206_vm12, %v382_v34, %v354_v61  ;;  %vm2207_vm10 = vcmp.eq.s32.totalorder %v1323_v24, 3  ;;  %vm2208_vm6 = vmmov %vm2204_vm11  ;;  %v269_v2 = vsel %vm244_vm0, %v266_v0, 0.0 }
  0xe1   : >> { %v357_v40 = vsel %vm2207_vm10, %v353_v30, %v328_v62  ;;  %v323_v1 = vsel %vm2208_vm6, %v1581_v46, %v294_v60  ;;  %vm2209_vm5 = vcmp.eq.s32.totalorder %v1294_v18, 5  ;;  %vm2210_vm11 = vcmp.eq.s32.totalorder %v1323_v24, 4  ;;  %vm2211_vm13 = vmmov %vm2207_vm10 }
  0xe2   : >> { %v412_v3 = vsel %vm2209_vm5, %v411_v37, %v383_v63  ;;  %v386_v45 = vsel %vm2210_vm11, %v382_v34, %v357_v40  ;;  %v352_v4 = vsel %vm2211_vm13, %v1584_v47, %v323_v1  ;;  %vm2212_vm12 = vcmp.eq.s32.totalorder %v1278_v14, 1  ;;  %vm2215_vm7 = vmmov %vm2210_vm11 }
  0xe3   : >> { %v298_v5 = vsel %vm2212_vm12, %v295_v20, %v269_v2  ;;  %vm2213_vm10 = vcmp.eq.s32.totalorder %v1294_v18, 6  ;;  %vm2214_vm6 = vcmp.eq.s32.totalorder %v1323_v24, 5  ;;  %v381_v0 = vsel %vm2215_vm7, %v1593_v49, %v352_v4 }
  0xe4   : >> { %v441_v6 = vsel %vm2213_vm10, %v440_v12, %v412_v3  ;;  %v415_v46 = vsel %vm2214_vm6, %v411_v37, %v386_v45  ;;  %vm2216_vm5 = vcmp.eq.s32.totalorder %v1278_v14, 2  ;;  %vm2217_vm11 = vcmp.eq.s32.totalorder %v1294_v18, 7  ;;  %vm2219_vm12 = vmmov %vm2214_vm6 }
  0xe5   : >> { %v327_v19 = vsel %vm2216_vm5, %v324_v27, %v298_v5  ;;  %v470_v21 = vsel %vm2217_vm11, %v469_v43, %v441_v6  ;;  %vm2218_vm13 = vcmp.eq.s32.totalorder %v1323_v24, 6  ;;  %v410_v20 = vsel %vm2219_vm12, %v1596_v50, %v381_v0 }
  0xe6   : >> { %v444_v47 = vsel %vm2218_vm13, %v440_v12, %v415_v46  ;;  %vm2220_vm10 = vcmp.eq.s32.totalorder %v1278_v14, 3  ;;  %vm2221_vm6 = vcmp.eq.s32.totalorder %v1294_v18, 8  ;;  %vm2222_vm7 = vmmov %vm2218_vm13  ;;  %vm2223_vm5 = vcmp.eq.s32.totalorder %v1278_v14, 4 }
  0xe7   : >> { %v356_v7 = vsel %vm2220_vm10, %v353_v30, %v327_v19  ;;  %v499_v22 = vsel %vm2221_vm6, %v498_v13, %v470_v21  ;;  %v439_v49 = vsel %vm2222_vm7, %v1604_v52, %v410_v20  ;;  %vm2224_vm11 = vcmp.eq.s32.totalorder %v1294_v18, 9 }
  0xe8   : >> { %v385_v23 = vsel %vm2223_vm5, %v382_v34, %v356_v7  ;;  %v528_v25 = vsel %vm2224_vm11, %v527_v48, %v499_v22  ;;  %vm2225_vm13 = vcmp.eq.s32.totalorder %v1323_v24, 7  ;;  %vm2228_vm10 = vcmp.eq.s32.totalorder %v1278_v14, 5 }
  0xe9   : >> { %v473_v8 = vsel %vm2225_vm13, %v469_v43, %v444_v47  ;;  %vm2226_vm12 = vmmov %vm2225_vm13  ;;  %v414_v26 = vsel %vm2228_vm10, %v411_v37, %v385_v23  ;;  %585 = vrot.lane.b32.xlu0 %v528_v25, %s989_s14  ;;  %vm2229_vm6 = vcmp.eq.s32.totalorder %v1323_v24, 8  ;;  %vm2231_vm7 = vcmp.eq.s32.totalorder %v1278_v14, 6 }
  0xea   : >> { %v468_v50 = vsel %vm2226_vm12, %v1607_v53, %v439_v49  ;;  %v443_v27 = vsel %vm2231_vm7, %v440_v12, %v414_v26  ;;  %vm2232_vm5 = vcmp.eq.s32.totalorder %v1278_v14, 7  ;;  %vm2233_vm11 = vmmov %vm2229_vm6  ;;  %vm2235_vm13 = vcmp.eq.s32.totalorder %v1278_v14, 8 }
  0xeb   : >> { %v497_v52 = vsel %vm2229_vm6, %v1616_v55, %v468_v50  ;;  %v472_v53 = vsel %vm2232_vm5, %v469_v43, %v443_v27  ;;  %v502_v9 = vsel %vm2233_vm11, %v498_v13, %v473_v8  ;;  %vm2237_vm12 = vcmp.eq.s32.totalorder %v1278_v14, 9 }
  0xec   : >> { %v526_v28 = vsel %vm506_vm4, %v1619_v56, %v497_v52  ;;  %v501_v29 = vsel %vm2235_vm13, %v498_v13, %v472_v53  ;;  %v531_v55 = vsel %vm506_vm4, %v527_v48, %v502_v9  ;;  %v256_v31 = vstv %s2227_s16  ;;  %s2270_s16 = sshll.u32 %s981_s11, 5  ;;  %s235_s11 = sadd.s32 1, %s981_s11  }
  0xed   : >> { %574 = vrot.lane.b32.xlu2 %v526_v28, %s988_s8  ;;  %v530_v30 = vsel %vm2237_vm12, %v527_v48, %v501_v29  ;;  %v259_v32 = vsel %vm244_vm0, %v256_v31, 0.0  ;;  %v285_v34 = vstv %s2230_s17  ;;  %vm2239_vm10 = vcmp.eq.s32.totalorder %v1278_v14, 1  ;;  %s2252_s8 = sld [smem:[#allocation39_spill]]  ;;  %s1946_s17 = scalar_lea.vmem %s1222_s22, %s2270_s16 [#allocation7] }
  0xee   : >> { %v288_v35 = vsel %vm2239_vm10, %v285_v34, %v259_v32  ;;  %v314_v37 = vstv %s2234_s7  ;;  %vm2241_vm6 = vcmp.eq.s32.totalorder %v1278_v14, 2  ;;  %vm2242_vm7 = vcmp.eq.s32.totalorder %v1389_v42, 0  ;;  %p232_p4 = scmp.ge.s32.totalorder %s235_s11, 2  }
  0xef   : >> { %v317_v11 = vsel %vm2241_vm6, %v314_v37, %v288_v35  ;;  %v258_v38 = vsel %vm2242_vm7, %v256_v31, 0.0  ;;  %v343_v39 = vstv %s2236_s3  ;;  %vm2243_vm5 = vcmp.eq.s32.totalorder %v1278_v14, 3  ;;  %s2276_s7 = sld [smem:[#allocation15_spill]] (%p232_p4) }
  0xf0   : >> { %v346_v12 = vsel %vm2243_vm5, %v343_v39, %v317_v11  ;;  %vm2245_vm0 = vcmp.eq.s32.totalorder %v1389_v42, 1  ;;  %vm2246_vm11 = vcmp.eq.s32.totalorder %v1294_v18, 0  ;;  %v372_v44 = vstv %s2238_s5 }
  0xf1   : >> { %591 = vrot.lane.b32.xlu0 %v531_v55, %s989_s14  ;;  %v287_v41 = vsel %vm2245_vm0, %v285_v34, %v258_v38  ;;  %v257_v43 = vsel %vm2246_vm11, %v256_v31, 0.0  ;;  %vm2247_vm13 = vcmp.eq.s32.totalorder %v1278_v14, 4  ;;  %vm2249_vm12 = vcmp.eq.s32.totalorder %v1294_v18, 1 }
  0xf2   : >> { %v375_v15 = vsel %vm2247_vm13, %v372_v44, %v346_v12  ;;  %v316_v48 = vsel %vm301_vm1, %v314_v37, %v287_v41  ;;  %v286_v16 = vsel %vm2249_vm12, %v285_v34, %v257_v43  ;;  %v401_v51 = vstv %s2240_s1 }
  0xf3   : >> { %v532_v54 = vlaneseq  ;;  %vm2250_vm10 = vcmp.eq.s32.totalorder %v1278_v14, 5  ;;  %v345_v59 = vsel %vm330_vm3, %v343_v39, %v316_v48  ;;  %vm2251_vm6 = vcmp.eq.s32.totalorder %v1294_v18, 2 }
  0xf4   : >> { %v404_v58 = vsel %vm2250_vm10, %v401_v51, %v375_v15  ;;  %v315_v61 = vsel %vm2251_vm6, %v314_v37, %v286_v16  ;;  %v430_v62 = vstv %s2244_s0  ;;  %vm2253_vm1 = vcmp.eq.s32.totalorder %v1323_v24, 0 }
  0xf5   : >> { %589 = vrot.lane.b32.xlu2 %v530_v30, %s989_s14  ;;  %v260_v60 = vsel %vm2253_vm1, %v256_v31, 0.0  ;;  %vm2254_vm7 = vcmp.eq.s32.totalorder %v1278_v14, 6  ;;  %v374_v40 = vsel %vm359_vm14, %v372_v44, %v345_v59  ;;  %v1878_v1 = vand.u32 127, %v532_v54  ;;  %s2257_s14 = sld [smem:[#allocation40_spill]]  ;;  %s784_s5 = sshll.u32 (%p232_p4), %s2276_s7, 6 }
  0xf6   : >> { %v433_v63 = vsel %vm2254_vm7, %v430_v62, %v404_v58  ;;  %vm2255_vm5 = vcmp.eq.s32.totalorder %v1294_v18, 3  ;;  %v459_v3 = vstv %s2248_s6  ;;  %vm2256_vm3 = vcmp.eq.s32.totalorder %v1323_v24, 1  ;;  %s2278_s6 = sld [smem:[#allocation55_spill]] (%p232_p4) }
  0xf7   : >> { %v344_v2 = vsel %vm2255_vm5, %v343_v39, %v315_v61  ;;  %v289_v4 = vsel %vm2256_vm3, %v285_v34, %v260_v60  ;;  %vm2258_vm0 = vcmp.eq.s32.totalorder %v1278_v14, 7  ;;  %v403_v6 = vsel %vm388_vm15, %v401_v51, %v374_v40 }
  0xf8   : >> { %v462_v5 = vsel %vm2258_vm0, %v459_v3, %v433_v63  ;;  %vm2259_vm11 = vcmp.eq.s32.totalorder %v1294_v18, 4  ;;  %vm555_vm14 = vcmp.ge.s32.totalorder %v1878_v1, 1  ;;  %vm542_vm13 = vcmp.ge.s32.totalorder %v1878_v1, 2 }
  0xf9   : >> { %v373_v46 = vsel %vm2259_vm11, %v372_v44, %v344_v2  ;;  %v488_v19 = vstv %s2252_s8  ;;  %vm2260_vm12 = vcmp.eq.s32.totalorder %v1323_v24, 2  ;;  %vm2261_vm10 = vcmp.eq.s32.totalorder %v1278_v14, 8 }
  0xfa   : >> { %v318_v20 = vsel %vm2260_vm12, %v314_v37, %v289_v4  ;;  %v491_v7 = vsel %vm2261_vm10, %v488_v19, %v462_v5  ;;  %v432_v22 = vsel %vm417_vm2, %v430_v62, %v403_v6  ;;  %vm2262_vm15 = vcmp.eq.s32.totalorder %v1294_v18, 5 }
  0xfb   : >> { %v402_v23 = vsel %vm2262_vm15, %v401_v51, %v373_v46  ;;  %v517_v25 = vstv %s2257_s14  ;;  %vm2263_vm6 = vcmp.eq.s32.totalorder %v1323_v24, 3  ;;  %vm2264_vm1 = vcmp.eq.s32.totalorder %v1278_v14, 9  ;;  %s620_s14 = sshll.u32 (%p232_p4), %s1222_s22, 4  ;;  %s621_s14 = int_to_ptr.vmem [resolvable:$true] %s620_s14 }
  0xfc   : >> { %v347_v50 = vsel %vm2263_vm6, %v343_v39, %v318_v20  ;;  %v520_v26 = vsel %vm2264_vm1, %v517_v25, %v491_v7  ;;  %v461_v52 = vsel %vm446_vm9, %v459_v3, %v432_v22  ;;  %vm2265_vm7 = vcmp.eq.s32.totalorder %v1294_v18, 6  ;;  %s619_s8 = scalar_lea.hbm (%p232_p4), %s2278_s6, %s784_s5  ;;  %s923_s12 = scalar_lea.hbm (%p232_p4), %s2278_s6, 128 }
  0xfd   : >> { %v431_v27 = vsel %vm2265_vm7, %v430_v62, %v402_v23  ;;  %vm593_vm2 = vcmp.lt.s32.totalorder %v1878_v1, 126  ;;  %vm576_vm5 = vcmp.lt.s32.totalorder %v1878_v1, 127  ;;  %vm2266_vm3 = vcmp.eq.s32.totalorder %v1323_v24, 4  ;;  %s622_s16 = sshll.u32 (%p232_p4), %s619_s8, 4  ;;  %s623_s16 = int_to_ptr.hbm [resolvable:$true] %s622_s16 }
  0xfe   : >> { %v376_v14 = vsel %vm2266_vm3, %v372_v44, %v347_v50  ;;  %v490_v55 = vsel %vm475_vm8, %v488_v19, %v461_v52  ;;  %vm2267_vm9 = vcmp.eq.s32.totalorder %v1294_v18, 7  ;;  %vm2268_vm8 = vcmp.eq.s32.totalorder %v1323_v24, 5  ;;  %s917_s11 = sshra.s32 (%p232_p4), %s623_s16, 4  ;;  %s918_s11 = int_to_ptr.hbm [resolvable:$true] %s917_s11 }
  0xff   : >> { %v460_v31 = vsel %vm2267_vm9, %v459_v3, %v431_v27  ;;  %v405_v11 = vsel %vm2268_vm8, %v401_v51, %v376_v14  ;;  %vm2269_vm0 = vcmp.eq.s32.totalorder %v1389_v42, 9  ;;  %vm2271_vm11 = vcmp.eq.s32.totalorder %v1294_v18, 8  ;;  %s919_s2 = scalar_lea.hbm (%p232_p4), %s918_s11, 64  ;;  %p924_p3 = scmp.lt.s32.totalorder (%p232_p4), %s918_s11, %s2278_s6 }
 0x100   : >> { %v519_v38 = vsel %vm2269_vm0, %v517_v25, %v490_v55  ;;  %v489_v39 = vsel %vm2271_vm11, %v488_v19, %v460_v31  ;;  %vm2272_vm12 = vcmp.eq.s32.totalorder %v1323_v24, 6  ;;  %vm2273_vm10 = vcmp.eq.s32.totalorder %v1294_v18, 9  ;;  %p920_p6 = scmp.ne.s32.totalorder (%p232_p4), %s918_s11, %s919_s2  ;;  %p925_p5 = scmp.lt.s32.totalorder (%p232_p4), %s923_s12, %s919_s2 }
 0x101   : >> { %v434_v43 = vsel %vm2272_vm12, %v430_v62, %v405_v11  ;;  %v518_v42 = vsel %vm2273_vm10, %v517_v25, %v489_v39  ;;  %vm2274_vm15 = vcmp.eq.s32.totalorder %v1323_v24, 7  ;;  %vm2275_vm6 = vcmp.eq.s32.totalorder %v1323_v24, 8 }
 0x102   : >> { %v463_v16 = vsel %vm2274_vm15, %v459_v3, %v434_v43  ;;  %p921_p13 = pnand (%p232_p4), %p920_p6, %p1059_p11  ;;  %p926_p8 = por (%p232_p4), %p925_p5, %p924_p3 }
 0x103   : >> { %v492_v61 = vsel %vm2275_vm6, %v488_v19, %v463_v16 }
 0x104   : >> { %v521_v40 = vsel %vm506_vm4, %v517_v25, %v492_v61  ;;  %p922_p0 = pneg (%p232_p4), %p921_p13 }
 0x106   : > { %p927_p9 = pnand (%p232_p4), %p926_p8, %p922_p0 }
 0x11d   : >> { %v1831_v56 = vpop.permute.xlu2 %547 }
 0x11f   : >> { %v539_v33 = vpop.permute.xlu1 %538 }
 0x120   : >> { %v545_v49 = vsel %vm542_vm13, %v539_v33, 0.0 }
 0x122   : >> { %v1839_v36 = vpop.permute.xlu0 %534 }
 0x123   : >> { %v543_v37 = vsel %vm542_vm13, %v1839_v36, 0.0 }
 0x126   : >> { %v550_v10 = vpop.permute.xlu2 %549 }
 0x127   : >> { %v1853_v13 = vpop.permute.xlu1 %540  ;;  %v557_v28 = vsel %vm555_vm14, %v550_v10, 0.0  ;;  %v556_v10 = vsel %vm555_vm14, %v1831_v56, 0.0 }
 0x128   : >> { %v560_v36 = vadd.f32 %v556_v10, %v543_v37  ;;  %v546_v18 = vsel %vm542_vm13, %v1853_v13, 0.0 }
 0x12a   : >> { %v564_v54 = vadd.f32 %v560_v36, %v518_v42 }
 0x12e   : >> { %v537_v57 = vpop.permute.xlu0 %536 }
 0x12f   : >> { %v544_v53 = vsel %vm542_vm13, %v537_v57, 0.0 }
 0x130   : >> { %v561_v34 = vadd.f32 %v557_v28, %v544_v53 }
 0x132   : >> { %v565_v44 = vadd.f32 %v561_v34, %v519_v38 }
 0x135   : >> { %v1863_v17 = vpop.permute.xlu2 %568 }
 0x136   : >> { %v577_v58 = vsel %vm576_vm5, %v1863_v17, 0.0 }
 0x137   : >> { %v581_v62 = vadd.f32 %v577_v58, %v564_v54 }
 0x138   : >> { %v554_v45 = vpop.permute.xlu1 %553 }
 0x139   : >> { %v552_v21 = vpop.permute.xlu0 %551  ;;  %v559_v59 = vsel %vm555_vm14, %v554_v45, 0.0 }
 0x13a   : >> { %v558_v47 = vsel %vm555_vm14, %v552_v21, 0.0  ;;  %v563_v60 = vadd.f32 %v559_v59, %v546_v18 }
 0x13b   : >> { %v562_v8 = vadd.f32 %v558_v47, %v545_v49 }
 0x13c   : >> { %v567_v3 = vadd.f32 %v563_v60, %v521_v40 }
 0x13d   : >> { %v566_v29 = vadd.f32 %v562_v8, %v520_v26 }
 0x147   : >> { %v1891_v0 = vpop.permute.xlu2 %574  ;;  %v573_v9 = vpop.permute.xlu1 %572 }
 0x148   : >> { %v579_v32 = vsel %vm576_vm5, %v573_v9, 0.0  ;;  %v580_v13 = vsel %vm576_vm5, %v1891_v0, 0.0 }
 0x149   : >> { %v583_v35 = vadd.f32 %v579_v32, %v566_v29  ;;  %v584_v45 = vadd.f32 %v580_v13, %v567_v3 }
 0x14b   : >> { %v571_v12 = vpop.permute.xlu0 %570 }
 0x14c   : >> { %v578_v56 = vsel %vm576_vm5, %v571_v12, 0.0 }
 0x14d   : >> { %v582_v15 = vadd.f32 %v578_v56, %v565_v44 }
 0x14f   : >> { %v590_v30 = vpop.permute.xlu2 %589 }
 0x150   : >> { %v596_v33 = vsel %vm593_vm2, %v590_v30, 0.0  ;;  %v588_v48 = vpop.permute.xlu1 %587 }
 0x151   : >> { %v600_v41 = vadd.f32 %v596_v33, %v583_v35  ;;  %v595_v51 = vsel %vm593_vm2, %v588_v48, 0.0 }
 0x152   : >> { %v599_v57 = vadd.f32 %v595_v51, %v582_v15 }
 0x153   : >> { %605 = vst [vmem:[%s1946_s17 + $0x10] sm:$0xff] %v600_v41 }
 0x154   : >> { %604 = vst [vmem:[%s1946_s17 + $0x8] sm:$0xff] %v599_v57 }
 0x15b   : >> { %v586_v63 = vpop.permute.xlu0 %585 }
 0x15c   : >> { %v594_v17 = vsel %vm593_vm2, %v586_v63, 0.0 }
 0x15d   : >> { %v598_v2 = vadd.f32 %v594_v17, %v581_v62 }
 0x15f   : >> { %603 = vst [vmem:[%s1946_s17] sm:$0xff] %v598_v2 }
 0x163   : >> { %v592_v4 = vpop.permute.xlu0 %591  ;;  %234 = sbr.rel (!%p232_p4) target bundleno = 150 (0x96), region = 87 }
 0x164   : >> { %v597_v5 = vsel %vm593_vm2, %v592_v4, 0.0 }
 0x165   : >> { %v601_v6 = vadd.f32 %v597_v5, %v584_v45 }
 0x167   : >> { %606 = vst [vmem:[%s1946_s17 + $0x18] sm:$0xff] %v601_v6  ;;  %s608_s17 = scalar_lea.sflag (%p232_p4), [#allocation4], %s1104_s4 }
 0x168   : > { %930 = shalt.err (!%p927_p9)
}
 0x169   : > { %s990_s18 = smov 128   ;;  %s991_s21 = smov 8  }
 0x16a   : > { %791 = dma.vmem_to_hbm [thread:$0]  (%p1059_p11), %s621_s14, 1024, %s623_s16, %s608_s17, %s990_s18, %s990_s18, %s991_s21  }
 0x16b PF: > { %s2279_s22 = sld [smem:[#allocation11_spill]] }
 0x16c   : > { %s2281_s23 = sld [smem:[#allocation14_spill]] }
 0x171   : > { %s637_s28 = sand.u32 1, %s2279_s22  }
 0x172   : > { %p2282_p10 = scmp.ge.s32.totalorder %s2281_s23, 2  ;;  %s638_s20 = scalar_lea.sflag [#allocation4], %s637_s28 }
 0x174   : > { %p802_p1 = pnand %p2282_p10, %p1063_p12 }
 0x176   : > { %p803_p2 = pneg %p802_p1 }
 0x178   : > { %960 = dma.done.wait (%p803_p2), %s638_s20, 1024  }
 0x179   : > { %962 = vsyncadd (%p803_p2), %s638_s20, 4294966272  ;;  %s2283_s12 = sld [smem:[#allocation16_spill]] }
 0x17a   : > { %s2284_s9 = sld [smem:[#allocation12_spill]] }
 0x17b   : > { %s2285_s10 = sld [smem:[#allocation13_spill]] }
 0x17c   : > { %s2286_s11 = sld [smem:[#allocation17_spill]] }
 0x17f   : > { %p16_p7 = scmp.ge.s32.totalorder %s2283_s12, 4  }
 0x181   :  { %18 = sbr.rel (!%p16_p7) target bundleno = 10 (0xa), region = 98 }
 0x186   :  { %644 = vsyncpa [#allocation3], 1 }
 0x187   :  { %646 = vsyncpa [#allocation3 + $0x1], 1 }
 0x188   :  { %647 = vsyncpa [#allocation4], 1 }
 0x189   :  { %649 = vsyncpa [#allocation4 + $0x1], 1 }
 0x18a   :  { %650 = vsyncpa [#allocation5], 1 }
 0x18b   :  { %652 = vsyncpa [#allocation5 + $0x1], 1 }

</bundles_post_ra>
